<compile_context>
chip_gen: v5e
topology: v5e:2x2
jax: 0.10.0
libtpu: 0.0.40
codegen_flags: <defaults>
</compile_context>

<pallas_src>
import jax
import jax.numpy as jnp
from jax.experimental import pallas as pl
from jax.experimental.pallas import tpu as pltpu


def scorenet_kernel(pa_ref, pb_ref, w2_ref, b2_ref, w3_ref, b3_ref,
                    w4_ref, b4_ref, o_ref):
    """One (i-tile, j-tile) block of pairwise scores through conv1..conv4."""
    ti = pa_ref.shape[1]
    tj = pb_ref.shape[1]

    pa = pa_ref[0]                       # (ti, 256) f32, conv1 bias folded in
    pb = pb_ref[0]                       # (tj, 256) f32

    # conv1 + bn1 + relu as an outer broadcast-add (VPU), rows = (i, j) pairs.
    h1 = jnp.maximum(pa[:, None, :] + pb[None, :, :], 0.0)      # (ti, tj, 256)
    h1 = h1.reshape(ti * tj, 256).astype(jnp.bfloat16)          # (R, 256)

    # conv2 + bn2 + relu (MXU, bf16 operands, f32 accumulation).
    h2 = jnp.dot(h1, w2_ref[...], preferred_element_type=jnp.float32)
    h2 = jnp.maximum(h2 + b2_ref[...], 0.0).astype(jnp.bfloat16)  # (R, 128)

    # conv3 + bn3 + relu.
    h3 = jnp.dot(h2, w3_ref[...], preferred_element_type=jnp.float32)
    h3 = jnp.maximum(h3 + b3_ref[...], 0.0).astype(jnp.bfloat16)  # (R, 64)

    # conv4 (64 -> 1): (1,64) @ (64,R) puts the per-pixel scores on lanes so
    # the (1, ti, tj) output block can be stored lane-dense.
    out = jnp.dot(w4_ref[...], h3.T, preferred_element_type=jnp.float32)
    out = out + b4_ref[...]                                       # (1, R)

    for il in range(ti):                 # static unroll: one (1, tj) row per i
        row = out[:, il * tj:(il + 1) * tj]                       # (1, tj)
        o_ref[:, il:il + 1, :] = row[None].astype(o_ref.dtype)


def _fold_bn(w, b, gamma, beta, mean, var, eps=1e-5):
    """Fold eval-mode BatchNorm into a preceding 1x1 conv (W: (Cin, Cout))."""
    scale = gamma / jnp.sqrt(var + eps)
    return w * scale[None, :], (b - mean) * scale + beta


def _pick_tiles(n, target_rows=4096):
    """tj: output lane axis (multiple of 128, else full N).
       ti: small sublane axis the kernel unrolls over (multiple of 8, else N)."""
    tj = next((c for c in (512, 256, 128) if n % c == 0), n)
    if n % 8 != 0:
        return n, tj
    ti = max(8, min(32, (target_rows // tj) // 8 * 8))
    while n % ti:
        ti -= 8
    return max(ti, 8), tj


@jax.jit
def scorenet_forward(x, params):
    """x: (B, in_ch, N) float32 -> (B, N, N) float32."""
    B, C, N = x.shape
    ti, tj = _pick_tiles(N)
    assert N % ti == 0 and N % tj == 0

    w1, b1 = _fold_bn(params["w1"], params["b1"], *params["bn1"])
    w2, b2 = _fold_bn(params["w2"], params["b2"], *params["bn2"])
    w3, b3 = _fold_bn(params["w3"], params["b3"], *params["bn3"])
    w4, b4 = params["w4"], params["b4"]

    # conv1 split: conv1(cat(x_i, x_j)) == pa[b, i] + pb[b, j] (b1 in pa).
    xt = jnp.transpose(x, (0, 2, 1)).astype(jnp.float32)          # (B, N, C)
    pa = jnp.einsum("bnc,cf->bnf", xt, w1[:C]) + b1               # (B, N, 256)
    pb = jnp.einsum("bnc,cf->bnf", xt, w1[C:])                    # (B, N, 256)

    # bf16 MXU operands (f32 accumulation happens inside the kernel).
    w2b = w2.astype(jnp.bfloat16)
    w3b = w3.astype(jnp.bfloat16)
    w4r = w4.reshape(1, -1).astype(jnp.bfloat16)                  # (1, 64)
    b2r = b2[None, :]
    b3r = b3[None, :]
    b4r = b4.reshape(1, 1)

    const = lambda arr: pl.BlockSpec(arr.shape, lambda b, i, j: (0,) * arr.ndim)

    out = pl.pallas_call(
        scorenet_kernel,
        out_shape=jax.ShapeDtypeStruct((B, N, N), jnp.float32),
        grid_spec=pltpu.PrefetchScalarGridSpec(
            num_scalar_prefetch=0,
            grid=(B, N // ti, N // tj),
            in_specs=[
                pl.BlockSpec((1, ti, 256), lambda b, i, j: (b, i, 0)),  # pa
                pl.BlockSpec((1, tj, 256), lambda b, i, j: (b, j, 0)),  # pb
                const(w2b), const(b2r),
                const(w3b), const(b3r),
                const(w4r), const(b4r),
            ],
            out_specs=pl.BlockSpec((1, ti, tj), lambda b, i, j: (b, i, j)),
        ),
        compiler_params=pltpu.CompilerParams(
            dimension_semantics=("parallel", "parallel", "parallel"),
            vmem_limit_bytes=32 * 1024 * 1024),
    )(pa, pb, w2b, b2r, w3b, b3r, w4r, b4r)

    return out


def init_params(key, in_ch):
    """Deterministic synthetic parameters matching ScoreNet(in_ch) shapes."""
    dims = [2 * in_ch, 256, 128, 64, 1]
    keys = jax.random.split(key, 16)
    p = {}
    ki = 0
    for li in range(4):
        cin, cout = dims[li], dims[li + 1]
        # 1x1 conv weight (cout, cin, 1, 1) in torch -> stored here as (cin, cout)
        p[f"w{li+1}"] = 0.1 * jax.random.normal(keys[ki], (cin, cout), jnp.float32); ki += 1
        p[f"b{li+1}"] = 0.1 * jax.random.normal(keys[ki], (cout,), jnp.float32); ki += 1
        if li < 3:  # bn1..bn3: (gamma, beta, running_mean, running_var)
            gamma = 1.0 + 0.1 * jax.random.normal(keys[ki], (cout,), jnp.float32); ki += 1
            beta = 0.1 * jax.random.normal(keys[ki], (cout,), jnp.float32); ki += 1
            mean = 0.05 * jnp.arange(cout, dtype=jnp.float32) / cout
            var = jnp.ones((cout,), jnp.float32) + 0.01 * jnp.arange(cout, dtype=jnp.float32) / cout
            p[f"bn{li+1}"] = (gamma, beta, mean, var)
    return p


def scorenet_reference(x, params):
    """Plain-JAX f32 reference with the original pairwise-concat math."""
    B, C, N = x.shape
    xi = jnp.broadcast_to(x[:, :, :, None], (B, C, N, N))
    xt = jnp.transpose(xi, (0, 1, 3, 2))
    h = jnp.transpose(jnp.concatenate([xi, xt], axis=1), (0, 2, 3, 1)).reshape(-1, 2 * C)
    for li in range(1, 4):
        w, b = _fold_bn(params[f"w{li}"], params[f"b{li}"], *params[f"bn{li}"])
        h = jnp.maximum(h @ w + b, 0.0)
    h = h @ params["w4"] + params["b4"]
    return h.reshape(B, N, N)


if __name__ == "__main__":
    B, in_ch, n_points = 2, 4, 16          # x: (batch, in_ch, n_points)
    key = jax.random.PRNGKey(0)
    kx, kp = jax.random.split(key)
    x = jax.random.normal(kx, (B, in_ch, n_points), jnp.float32)
    params = init_params(kp, in_ch)

    out = jax.block_until_ready(scorenet_forward(x, params))
    ref = scorenet_reference(x, params)

    assert out.shape == (B, n_points, n_points)
    # bf16 MXU operands -> compare against the f32 reference with a loose tol.
    assert jnp.allclose(out, ref, atol=3e-2, rtol=3e-2), (
        "mismatch vs reference: max abs err "
        f"{float(jnp.max(jnp.abs(out - ref)))}")
    print("KERNEL_OK")
</pallas_src>

<mosaic_0001>
module attributes {stable_mosaic.version = 11 : i64} {
  func.func @scorenet_kernel(%arg0: i32, %arg1: i32, %arg2: i32, %arg3: memref<1x16x256xf32, #tpu.memory_space<vmem>>, %arg4: memref<1x16x256xf32, #tpu.memory_space<vmem>>, %arg5: memref<256x128xbf16, #tpu.memory_space<vmem>>, %arg6: memref<1x128xf32, #tpu.memory_space<vmem>>, %arg7: memref<128x64xbf16, #tpu.memory_space<vmem>>, %arg8: memref<1x64xf32, #tpu.memory_space<vmem>>, %arg9: memref<1x64xbf16, #tpu.memory_space<vmem>>, %arg10: memref<1x1xf32, #tpu.memory_space<vmem>>, %arg11: memref<1x16x16xf32, #tpu.memory_space<vmem>>) attributes {dimension_semantics = [#tpu.dimension_semantics<parallel>, #tpu.dimension_semantics<parallel>, #tpu.dimension_semantics<parallel>], iteration_bounds = array<i64: 2, 1, 1>, scalar_prefetch = 0 : i64, scratch_operands = 0 : i64, tpu.core_type = #tpu.core_type<tc>, window_params = [{transform_indices = @transform_0, window_bounds = array<i64: 1, 16, 256>}, {transform_indices = @transform_1, window_bounds = array<i64: 1, 16, 256>}, {pipeline_mode = #tpu.pipeline_mode<synchronous>, transform_indices = @transform_2, window_bounds = array<i64: 256, 128>}, {pipeline_mode = #tpu.pipeline_mode<synchronous>, transform_indices = @transform_3, window_bounds = array<i64: 1, 128>}, {pipeline_mode = #tpu.pipeline_mode<synchronous>, transform_indices = @transform_4, window_bounds = array<i64: 128, 64>}, {pipeline_mode = #tpu.pipeline_mode<synchronous>, transform_indices = @transform_5, window_bounds = array<i64: 1, 64>}, {pipeline_mode = #tpu.pipeline_mode<synchronous>, transform_indices = @transform_6, window_bounds = array<i64: 1, 64>}, {pipeline_mode = #tpu.pipeline_mode<synchronous>, transform_indices = @transform_7, window_bounds = array<i64: 1, 1>}, {transform_indices = @transform_8, window_bounds = array<i64: 1, 16, 16>}]} {
    %c0 = arith.constant 0 : index
    %c0_0 = arith.constant 0 : index
    %c0_1 = arith.constant 0 : index
    %0 = vector.load %arg3[%c0, %c0_0, %c0_1] : memref<1x16x256xf32, #tpu.memory_space<vmem>>, vector<1x16x256xf32>
    %1 = vector.shape_cast %0 : vector<1x16x256xf32> to vector<16x256xf32>
    %c0_2 = arith.constant 0 : index
    %c0_3 = arith.constant 0 : index
    %c0_4 = arith.constant 0 : index
    %2 = vector.load %arg4[%c0_2, %c0_3, %c0_4] : memref<1x16x256xf32, #tpu.memory_space<vmem>>, vector<1x16x256xf32>
    %3 = vector.shape_cast %2 : vector<1x16x256xf32> to vector<16x256xf32>
    %4 = vector.shape_cast %1 : vector<16x256xf32> to vector<16x1x256xf32>
    %5 = vector.shape_cast %3 : vector<16x256xf32> to vector<1x16x256xf32>
    %6 = vector.broadcast %4 : vector<16x1x256xf32> to vector<16x16x256xf32>
    %7 = vector.broadcast %5 : vector<1x16x256xf32> to vector<16x16x256xf32>
    %8 = arith.addf %6, %7 : vector<16x16x256xf32>
    %cst = arith.constant 0.000000e+00 : f32
    %9 = vector.broadcast %cst : f32 to vector<16x16x256xf32>
    %10 = arith.maximumf %8, %9 : vector<16x16x256xf32>
    %11 = vector.shape_cast %10 : vector<16x16x256xf32> to vector<256x256xf32>
    %12 = arith.truncf %11 : vector<256x256xf32> to vector<256x256xbf16>
    %c0_5 = arith.constant 0 : index
    %c0_6 = arith.constant 0 : index
    %13 = vector.load %arg5[%c0_5, %c0_6] : memref<256x128xbf16, #tpu.memory_space<vmem>>, vector<256x128xbf16>
    %cst_7 = arith.constant dense<0.000000e+00> : vector<256x128xf32>
    %14 = tpu.matmul %12, %13, %cst_7 {dimension_numbers = #tpu.dot_dimension_numbers<[1], [0], [0], [1], [0, 0, 1, 1], [], []>} : vector<256x256xbf16>, vector<256x128xbf16>, vector<256x128xf32> -> vector<256x128xf32>
    %c0_8 = arith.constant 0 : index
    %c0_9 = arith.constant 0 : index
    %15 = vector.load %arg6[%c0_8, %c0_9] : memref<1x128xf32, #tpu.memory_space<vmem>>, vector<1x128xf32>
    %16 = vector.broadcast %15 : vector<1x128xf32> to vector<256x128xf32>
    %17 = arith.addf %14, %16 : vector<256x128xf32>
    %cst_10 = arith.constant 0.000000e+00 : f32
    %18 = vector.broadcast %cst_10 : f32 to vector<256x128xf32>
    %19 = arith.maximumf %17, %18 : vector<256x128xf32>
    %20 = arith.truncf %19 : vector<256x128xf32> to vector<256x128xbf16>
    %c0_11 = arith.constant 0 : index
    %c0_12 = arith.constant 0 : index
    %21 = vector.load %arg7[%c0_11, %c0_12] : memref<128x64xbf16, #tpu.memory_space<vmem>>, vector<128x64xbf16>
    %cst_13 = arith.constant dense<0.000000e+00> : vector<256x64xf32>
    %22 = tpu.matmul %20, %21, %cst_13 {dimension_numbers = #tpu.dot_dimension_numbers<[1], [0], [0], [1], [0, 0, 1, 1], [], []>} : vector<256x128xbf16>, vector<128x64xbf16>, vector<256x64xf32> -> vector<256x64xf32>
    %c0_14 = arith.constant 0 : index
    %c0_15 = arith.constant 0 : index
    %23 = vector.load %arg8[%c0_14, %c0_15] : memref<1x64xf32, #tpu.memory_space<vmem>>, vector<1x64xf32>
    %24 = vector.broadcast %23 : vector<1x64xf32> to vector<256x64xf32>
    %25 = arith.addf %22, %24 : vector<256x64xf32>
    %cst_16 = arith.constant 0.000000e+00 : f32
    %26 = vector.broadcast %cst_16 : f32 to vector<256x64xf32>
    %27 = arith.maximumf %25, %26 : vector<256x64xf32>
    %28 = arith.truncf %27 : vector<256x64xf32> to vector<256x64xbf16>
    %c0_17 = arith.constant 0 : index
    %c0_18 = arith.constant 0 : index
    %29 = vector.load %arg9[%c0_17, %c0_18] : memref<1x64xbf16, #tpu.memory_space<vmem>>, vector<1x64xbf16>
    %30 = tpu.transpose %28, [1, 0] : vector<256x64xbf16> -> vector<64x256xbf16>
    %cst_19 = arith.constant dense<0.000000e+00> : vector<1x256xf32>
    %31 = tpu.matmul %29, %30, %cst_19 {dimension_numbers = #tpu.dot_dimension_numbers<[1], [0], [0], [1], [0, 0, 1, 1], [], []>} : vector<1x64xbf16>, vector<64x256xbf16>, vector<1x256xf32> -> vector<1x256xf32>
    %c0_20 = arith.constant 0 : index
    %c0_21 = arith.constant 0 : index
    %32 = vector.load %arg10[%c0_20, %c0_21] : memref<1x1xf32, #tpu.memory_space<vmem>>, vector<1x1xf32>
    %33 = vector.broadcast %32 : vector<1x1xf32> to vector<1x256xf32>
    %34 = arith.addf %31, %33 : vector<1x256xf32>
    %35 = vector.extract_strided_slice %34 {offsets = [0, 0], sizes = [1, 16], strides = [1, 1]} : vector<1x256xf32> to vector<1x16xf32>
    %36 = vector.shape_cast %35 : vector<1x16xf32> to vector<1x1x16xf32>
    %c0_22 = arith.constant 0 : index
    %c0_23 = arith.constant 0 : index
    %c0_24 = arith.constant 0 : index
    %37 = vector.load %arg11[%c0_22, %c0_23, %c0_24] : memref<1x16x16xf32, #tpu.memory_space<vmem>>, vector<1x1x16xf32>
    tpu.vector_store %arg11[%c0_22, %c0_23, %c0_24], %36 {strides = array<i32>} : memref<1x16x16xf32, #tpu.memory_space<vmem>>, vector<1x1x16xf32>,
    %38 = vector.extract_strided_slice %34 {offsets = [0, 16], sizes = [1, 16], strides = [1, 1]} : vector<1x256xf32> to vector<1x16xf32>
    %39 = vector.shape_cast %38 : vector<1x16xf32> to vector<1x1x16xf32>
    %c0_25 = arith.constant 0 : index
    %c1 = arith.constant 1 : index
    %c0_26 = arith.constant 0 : index
    %40 = vector.load %arg11[%c0_25, %c1, %c0_26] : memref<1x16x16xf32, #tpu.memory_space<vmem>>, vector<1x1x16xf32>
    tpu.vector_store %arg11[%c0_25, %c1, %c0_26], %39 {strides = array<i32>} : memref<1x16x16xf32, #tpu.memory_space<vmem>>, vector<1x1x16xf32>,
    %41 = vector.extract_strided_slice %34 {offsets = [0, 32], sizes = [1, 16], strides = [1, 1]} : vector<1x256xf32> to vector<1x16xf32>
    %42 = vector.shape_cast %41 : vector<1x16xf32> to vector<1x1x16xf32>
    %c0_27 = arith.constant 0 : index
    %c2 = arith.constant 2 : index
    %c0_28 = arith.constant 0 : index
    %43 = vector.load %arg11[%c0_27, %c2, %c0_28] : memref<1x16x16xf32, #tpu.memory_space<vmem>>, vector<1x1x16xf32>
    tpu.vector_store %arg11[%c0_27, %c2, %c0_28], %42 {strides = array<i32>} : memref<1x16x16xf32, #tpu.memory_space<vmem>>, vector<1x1x16xf32>,
    %44 = vector.extract_strided_slice %34 {offsets = [0, 48], sizes = [1, 16], strides = [1, 1]} : vector<1x256xf32> to vector<1x16xf32>
    %45 = vector.shape_cast %44 : vector<1x16xf32> to vector<1x1x16xf32>
    %c0_29 = arith.constant 0 : index
    %c3 = arith.constant 3 : index
    %c0_30 = arith.constant 0 : index
    %46 = vector.load %arg11[%c0_29, %c3, %c0_30] : memref<1x16x16xf32, #tpu.memory_space<vmem>>, vector<1x1x16xf32>
    tpu.vector_store %arg11[%c0_29, %c3, %c0_30], %45 {strides = array<i32>} : memref<1x16x16xf32, #tpu.memory_space<vmem>>, vector<1x1x16xf32>,
    %47 = vector.extract_strided_slice %34 {offsets = [0, 64], sizes = [1, 16], strides = [1, 1]} : vector<1x256xf32> to vector<1x16xf32>
    %48 = vector.shape_cast %47 : vector<1x16xf32> to vector<1x1x16xf32>
    %c0_31 = arith.constant 0 : index
    %c4 = arith.constant 4 : index
    %c0_32 = arith.constant 0 : index
    %49 = vector.load %arg11[%c0_31, %c4, %c0_32] : memref<1x16x16xf32, #tpu.memory_space<vmem>>, vector<1x1x16xf32>
    tpu.vector_store %arg11[%c0_31, %c4, %c0_32], %48 {strides = array<i32>} : memref<1x16x16xf32, #tpu.memory_space<vmem>>, vector<1x1x16xf32>,
    %50 = vector.extract_strided_slice %34 {offsets = [0, 80], sizes = [1, 16], strides = [1, 1]} : vector<1x256xf32> to vector<1x16xf32>
    %51 = vector.shape_cast %50 : vector<1x16xf32> to vector<1x1x16xf32>
    %c0_33 = arith.constant 0 : index
    %c5 = arith.constant 5 : index
    %c0_34 = arith.constant 0 : index
    %52 = vector.load %arg11[%c0_33, %c5, %c0_34] : memref<1x16x16xf32, #tpu.memory_space<vmem>>, vector<1x1x16xf32>
    tpu.vector_store %arg11[%c0_33, %c5, %c0_34], %51 {strides = array<i32>} : memref<1x16x16xf32, #tpu.memory_space<vmem>>, vector<1x1x16xf32>,
    %53 = vector.extract_strided_slice %34 {offsets = [0, 96], sizes = [1, 16], strides = [1, 1]} : vector<1x256xf32> to vector<1x16xf32>
    %54 = vector.shape_cast %53 : vector<1x16xf32> to vector<1x1x16xf32>
    %c0_35 = arith.constant 0 : index
    %c6 = arith.constant 6 : index
    %c0_36 = arith.constant 0 : index
    %55 = vector.load %arg11[%c0_35, %c6, %c0_36] : memref<1x16x16xf32, #tpu.memory_space<vmem>>, vector<1x1x16xf32>
    tpu.vector_store %arg11[%c0_35, %c6, %c0_36], %54 {strides = array<i32>} : memref<1x16x16xf32, #tpu.memory_space<vmem>>, vector<1x1x16xf32>,
    %56 = vector.extract_strided_slice %34 {offsets = [0, 112], sizes = [1, 16], strides = [1, 1]} : vector<1x256xf32> to vector<1x16xf32>
    %57 = vector.shape_cast %56 : vector<1x16xf32> to vector<1x1x16xf32>
    %c0_37 = arith.constant 0 : index
    %c7 = arith.constant 7 : index
    %c0_38 = arith.constant 0 : index
    %58 = vector.load %arg11[%c0_37, %c7, %c0_38] : memref<1x16x16xf32, #tpu.memory_space<vmem>>, vector<1x1x16xf32>
    tpu.vector_store %arg11[%c0_37, %c7, %c0_38], %57 {strides = array<i32>} : memref<1x16x16xf32, #tpu.memory_space<vmem>>, vector<1x1x16xf32>,
    %59 = vector.extract_strided_slice %34 {offsets = [0, 128], sizes = [1, 16], strides = [1, 1]} : vector<1x256xf32> to vector<1x16xf32>
    %60 = vector.shape_cast %59 : vector<1x16xf32> to vector<1x1x16xf32>
    %c0_39 = arith.constant 0 : index
    %c8 = arith.constant 8 : index
    %c0_40 = arith.constant 0 : index
    %61 = vector.load %arg11[%c0_39, %c8, %c0_40] : memref<1x16x16xf32, #tpu.memory_space<vmem>>, vector<1x1x16xf32>
    tpu.vector_store %arg11[%c0_39, %c8, %c0_40], %60 {strides = array<i32>} : memref<1x16x16xf32, #tpu.memory_space<vmem>>, vector<1x1x16xf32>,
    %62 = vector.extract_strided_slice %34 {offsets = [0, 144], sizes = [1, 16], strides = [1, 1]} : vector<1x256xf32> to vector<1x16xf32>
    %63 = vector.shape_cast %62 : vector<1x16xf32> to vector<1x1x16xf32>
    %c0_41 = arith.constant 0 : index
    %c9 = arith.constant 9 : index
    %c0_42 = arith.constant 0 : index
    %64 = vector.load %arg11[%c0_41, %c9, %c0_42] : memref<1x16x16xf32, #tpu.memory_space<vmem>>, vector<1x1x16xf32>
    tpu.vector_store %arg11[%c0_41, %c9, %c0_42], %63 {strides = array<i32>} : memref<1x16x16xf32, #tpu.memory_space<vmem>>, vector<1x1x16xf32>,
    %65 = vector.extract_strided_slice %34 {offsets = [0, 160], sizes = [1, 16], strides = [1, 1]} : vector<1x256xf32> to vector<1x16xf32>
    %66 = vector.shape_cast %65 : vector<1x16xf32> to vector<1x1x16xf32>
    %c0_43 = arith.constant 0 : index
    %c10 = arith.constant 10 : index
    %c0_44 = arith.constant 0 : index
    %67 = vector.load %arg11[%c0_43, %c10, %c0_44] : memref<1x16x16xf32, #tpu.memory_space<vmem>>, vector<1x1x16xf32>
    tpu.vector_store %arg11[%c0_43, %c10, %c0_44], %66 {strides = array<i32>} : memref<1x16x16xf32, #tpu.memory_space<vmem>>, vector<1x1x16xf32>,
    %68 = vector.extract_strided_slice %34 {offsets = [0, 176], sizes = [1, 16], strides = [1, 1]} : vector<1x256xf32> to vector<1x16xf32>
    %69 = vector.shape_cast %68 : vector<1x16xf32> to vector<1x1x16xf32>
    %c0_45 = arith.constant 0 : index
    %c11 = arith.constant 11 : index
    %c0_46 = arith.constant 0 : index
    %70 = vector.load %arg11[%c0_45, %c11, %c0_46] : memref<1x16x16xf32, #tpu.memory_space<vmem>>, vector<1x1x16xf32>
    tpu.vector_store %arg11[%c0_45, %c11, %c0_46], %69 {strides = array<i32>} : memref<1x16x16xf32, #tpu.memory_space<vmem>>, vector<1x1x16xf32>,
    %71 = vector.extract_strided_slice %34 {offsets = [0, 192], sizes = [1, 16], strides = [1, 1]} : vector<1x256xf32> to vector<1x16xf32>
    %72 = vector.shape_cast %71 : vector<1x16xf32> to vector<1x1x16xf32>
    %c0_47 = arith.constant 0 : index
    %c12 = arith.constant 12 : index
    %c0_48 = arith.constant 0 : index
    %73 = vector.load %arg11[%c0_47, %c12, %c0_48] : memref<1x16x16xf32, #tpu.memory_space<vmem>>, vector<1x1x16xf32>
    tpu.vector_store %arg11[%c0_47, %c12, %c0_48], %72 {strides = array<i32>} : memref<1x16x16xf32, #tpu.memory_space<vmem>>, vector<1x1x16xf32>,
    %74 = vector.extract_strided_slice %34 {offsets = [0, 208], sizes = [1, 16], strides = [1, 1]} : vector<1x256xf32> to vector<1x16xf32>
    %75 = vector.shape_cast %74 : vector<1x16xf32> to vector<1x1x16xf32>
    %c0_49 = arith.constant 0 : index
    %c13 = arith.constant 13 : index
    %c0_50 = arith.constant 0 : index
    %76 = vector.load %arg11[%c0_49, %c13, %c0_50] : memref<1x16x16xf32, #tpu.memory_space<vmem>>, vector<1x1x16xf32>
    tpu.vector_store %arg11[%c0_49, %c13, %c0_50], %75 {strides = array<i32>} : memref<1x16x16xf32, #tpu.memory_space<vmem>>, vector<1x1x16xf32>,
    %77 = vector.extract_strided_slice %34 {offsets = [0, 224], sizes = [1, 16], strides = [1, 1]} : vector<1x256xf32> to vector<1x16xf32>
    %78 = vector.shape_cast %77 : vector<1x16xf32> to vector<1x1x16xf32>
    %c0_51 = arith.constant 0 : index
    %c14 = arith.constant 14 : index
    %c0_52 = arith.constant 0 : index
    %79 = vector.load %arg11[%c0_51, %c14, %c0_52] : memref<1x16x16xf32, #tpu.memory_space<vmem>>, vector<1x1x16xf32>
    tpu.vector_store %arg11[%c0_51, %c14, %c0_52], %78 {strides = array<i32>} : memref<1x16x16xf32, #tpu.memory_space<vmem>>, vector<1x1x16xf32>,
    %80 = vector.extract_strided_slice %34 {offsets = [0, 240], sizes = [1, 16], strides = [1, 1]} : vector<1x256xf32> to vector<1x16xf32>
    %81 = vector.shape_cast %80 : vector<1x16xf32> to vector<1x1x16xf32>
    %c0_53 = arith.constant 0 : index
    %c15 = arith.constant 15 : index
    %c0_54 = arith.constant 0 : index
    %82 = vector.load %arg11[%c0_53, %c15, %c0_54] : memref<1x16x16xf32, #tpu.memory_space<vmem>>, vector<1x1x16xf32>
    tpu.vector_store %arg11[%c0_53, %c15, %c0_54], %81 {strides = array<i32>} : memref<1x16x16xf32, #tpu.memory_space<vmem>>, vector<1x1x16xf32>,
    return
  }
  func.func @transform_0(%arg0: i32, %arg1: i32, %arg2: i32) -> (i32, i32, i32) {
    %c0_i32 = arith.constant 0 : i32
    %c0_i32_0 = arith.constant 0 : i32
    return %arg0, %arg1, %c0_i32 : i32, i32, i32
  }
  func.func @transform_1(%arg0: i32, %arg1: i32, %arg2: i32) -> (i32, i32, i32) {
    %c0_i32 = arith.constant 0 : i32
    %c0_i32_0 = arith.constant 0 : i32
    return %arg0, %arg2, %c0_i32 : i32, i32, i32
  }
  func.func @transform_2(%arg0: i32, %arg1: i32, %arg2: i32) -> (i32, i32) {
    %c0_i32 = arith.constant 0 : i32
    %c0_i32_0 = arith.constant 0 : i32
    %c0_i32_1 = arith.constant 0 : i32
    return %c0_i32, %c0_i32_0 : i32, i32
  }
  func.func @transform_3(%arg0: i32, %arg1: i32, %arg2: i32) -> (i32, i32) {
    %c0_i32 = arith.constant 0 : i32
    %c0_i32_0 = arith.constant 0 : i32
    %c0_i32_1 = arith.constant 0 : i32
    return %c0_i32, %c0_i32_0 : i32, i32
  }
  func.func @transform_4(%arg0: i32, %arg1: i32, %arg2: i32) -> (i32, i32) {
    %c0_i32 = arith.constant 0 : i32
    %c0_i32_0 = arith.constant 0 : i32
    %c0_i32_1 = arith.constant 0 : i32
    return %c0_i32, %c0_i32_0 : i32, i32
  }
  func.func @transform_5(%arg0: i32, %arg1: i32, %arg2: i32) -> (i32, i32) {
    %c0_i32 = arith.constant 0 : i32
    %c0_i32_0 = arith.constant 0 : i32
    %c0_i32_1 = arith.constant 0 : i32
    return %c0_i32, %c0_i32_0 : i32, i32
  }
  func.func @transform_6(%arg0: i32, %arg1: i32, %arg2: i32) -> (i32, i32) {
    %c0_i32 = arith.constant 0 : i32
    %c0_i32_0 = arith.constant 0 : i32
    %c0_i32_1 = arith.constant 0 : i32
    return %c0_i32, %c0_i32_0 : i32, i32
  }
  func.func @transform_7(%arg0: i32, %arg1: i32, %arg2: i32) -> (i32, i32) {
    %c0_i32 = arith.constant 0 : i32
    %c0_i32_0 = arith.constant 0 : i32
    %c0_i32_1 = arith.constant 0 : i32
    return %c0_i32, %c0_i32_0 : i32, i32
  }
  func.func @transform_8(%arg0: i32, %arg1: i32, %arg2: i32) -> (i32, i32, i32) {
    %c0_i32 = arith.constant 0 : i32
    return %arg0, %arg1, %arg2 : i32, i32, i32
  }
}

</mosaic_0001>

<bundles_post_ra>
// kernel: scorenet_forward.1
= control target key start
LH: loop header
LB: loop body
LE: loop exit
PB: predicated region body
PF: predicated region fallthrough
CT: control target
= control target key end

     0   :  { %s2304_s0 = inlined_call_operand.vmem [shape: f32[2,16,256], index: 0, kind: input, shape index: {}]   ;;  %s2305_s1 = inlined_call_operand.vmem [shape: f32[2,16,256], index: 1, kind: input, shape index: {}]   ;;  %s2306_s2 = inlined_call_operand.vmem [shape: bf16[256,128], index: 2, kind: input, shape index: {}]   ;;  %s2307_s3 = inlined_call_operand.vmem [shape: f32[1,128], index: 3, kind: input, shape index: {}]   ;;  %s2308_s4 = inlined_call_operand.vmem [shape: bf16[128,64], index: 4, kind: input, shape index: {}]   ;;  %s2309_s5 = inlined_call_operand.vmem [shape: f32[1,64], index: 5, kind: input, shape index: {}]   ;;  %s2310_s6 = inlined_call_operand.vmem [shape: bf16[1,64], index: 6, kind: input, shape index: {}]   ;;  %s2311_s7 = inlined_call_operand.<no memory space> [shape: f32[1,1], index: 7, kind: input, shape index: {}]   ;;  %s2312_s8 = inlined_call_operand.hbm [shape: f32[2,16,16], index: 8, kind: output, shape index: {}]  }
   0x1   :  { %v13_v0 = vstv %s2311_s7 }
   0x2   :  { %14 = vst [vmem:[#allocation2] sm:$0x1] %v13_v0 }
   0x3   :  { %15 = vsyncpa [#allocation4], 0 }
   0x4   :  { %17 = vsyncpa [#allocation4 + $0x1], 0  ;;  %s1846_s29 = smov 0   ;;  %s1848_s30 = smov 0  }
   0x5   :  { %s1850_s9 = smov 0   ;;  %s1852_s10 = smov 0  }
   0x6   :  { %s1854_s11 = smov 0   ;;  %s1856_s12 = smov 0  }
   0x7 LB: > { %s1500_s7 = sadd.s32 4294967295, %s1786_s12   ;;  %s1501_s13 = sadd.s32 4294967294, %s1786_s12   ;;  %s1786_s12 = sphi %s1856_s12, %s23_s12   ;;  %s1782_s11 = sphi %s1854_s11, %s2319_s11   ;;  %s1778_s10 = sphi %s1852_s10, %s2318_s10   ;;  %s1774_s9 = sphi %s1850_s9, %s2317_s9   ;;  %s1770_s30 = sphi %s1848_s30, %s2316_s30   ;;  %s1766_s29 = sphi %s1846_s29, %s2315_s29  }
   0x8   : > { %s42_s14 = sadd.s32 1, %s1782_s11  ;;  %s235_s15 = sadd.s32 1, %s1774_s9 }
   0x9   : > { %p44_p0 = scmp.ge.s32.totalorder %s42_s14, 2  ;;  %p245_p1 = scmp.ne.s32.totalorder %s1774_s9, %s1770_s30 }
   0xa   : > { %p246_p2 = scmp.eq.s32.totalorder %s1500_s7, 1  ;;  %p251_p3 = scmp.ne.s32.totalorder %s1770_s30, %s1766_s29 }
   0xb   : > { %s2321_s14 = smov (%p44_p0, %s42_s14), 0  ;;  %p252_p5 = scmp.eq.s32.totalorder %s1501_s13, 1 }
   0xc   : > { %p1886_p4 = por %p246_p2, %p245_p1  ;;  %s228_s17 = ssub.s32 %s1782_s11, %s2321_s14 }
   0xd   : > { %p1504_p6 = scmp.ge.s32.totalorder %s1786_s12, 1  ;;  %p233_p7 = scmp.eq.s32.totalorder %s228_s17, 0 }
   0xe   : > { %p1893_p8 = por %p252_p5, %p251_p3  ;;  %p316_p9 = scmp.lt.s32.totalorder %s1786_s12, 3 }
   0xf   : > { %s1899_s19 = scalar_select %p233_p7, %s1774_s9, %s235_s15  }
  0x10   : > { %p317_p10 = pnand %p1504_p6, %p316_p9 }
  0x11   : > { %p366_p11 = scmp.lt.s32.totalorder (!%p317_p10), %s1778_s10, 1  ;;  %s362_s21 = sand.u32 (!%p317_p10), 1, %s1770_s30  }
  0x12   : > { %320 = sbr.rel (%p317_p10) target bundleno = 909 (0x38d), region = 52  ;;  %s1505_s22 = sshll.u32 (!%p317_p10), %s362_s21, 4 }
  0x13   : > { %s1789_s24 = smov (!%p317_p10), 96   ;;  %s1790_s25 = smov (!%p317_p10), 64  }
  0x14   : > { %s1791_s26 = smov (!%p317_p10), 112   ;;  %s1792_s27 = smov (!%p317_p10), 80  }
  0x15   : > { %s1639_s13 = sshll.u32 (!%p317_p10), %s1778_s10, 4 }
  0x17   : > { %v1622_v1 = vld [vmem:[%s2306_s2 + $0x38] sm:$0xff]  ;;  %v1621_v3 = vld [vmem:[%s2306_s2 + $0x30] sm:$0xff]  ;;  %s367_s28 = scalar_select %p366_p11, %s1778_s10, 1  ;;  %v1620_v5 = vld [vmem:[%s2306_s2 + $0x28] sm:$0xff]  ;;  %vm402_vm0 = vcmask 1040384   ;;  %vm404_vm1 = vcmask 1041409  }
  0x18   : > { %v1630_v2 = vld [vmem:[%s2306_s2 + $0x78] sm:$0xff]  ;;  %796 = vmatpush.bf16.msra.mxu0 %v1622_v1  ;;  %v1629_v4 = vld [vmem:[%s2306_s2 + $0x70] sm:$0xff]  ;;  %v1628_v6 = vld [vmem:[%s2306_s2 + $0x68] sm:$0xff]  ;;  %vm407_vm2 = vcmask 1042434   ;;  %vm410_vm3 = vcmask 1043459   ;;  %vm413_vm4 = vcmask 1044484  }
  0x19   : > { %885 = vmatpush.bf16.msra.mxu1 %v1630_v2  ;;  %s1613_s7 = sshll.u32 %s367_s28, 5  ;;  %v1619_v8 = vld [vmem:[%s2306_s2 + $0x20] sm:$0xff]  ;;  %v1618_v12 = vld [vmem:[%s2306_s2 + $0x18] sm:$0xff]  ;;  %v1617_v15 = vld [vmem:[%s2306_s2 + $0x10] sm:$0xff]  ;;  %vm416_vm5 = vcmask 1045509   ;;  %vm419_vm6 = vcmask 1046534  }
  0x1a   : > { %s1918_s17 = scalar_lea.vmem %s2304_s0, %s1613_s7  ;;  %v1627_v9 = vld [vmem:[%s2306_s2 + $0x60] sm:$0xff]  ;;  %v1626_v13 = vld [vmem:[%s2306_s2 + $0x58] sm:$0xff]  ;;  %s385_s23 = scalar_lea.vmem %s2305_s1, %s1613_s7  ;;  %v1625_v16 = vld [vmem:[%s2306_s2 + $0x50] sm:$0xff]  ;;  %vm422_vm7 = vcmask 1046528   ;;  %vm1235_vm8 = vcmask 523264   ;;  %vm1313_vm9 = vcmask 122880  }
  0x1b   : > { %v389_v7 = vld [vmem:[%s1918_s17 + $0x8] sm:$0xff]  ;;  %v1936_v11 = vld [vmem:[%s1918_s17] sm:$0xff]  ;;  %v1960_v21 = vld [vmem:[%s385_s23 + $0x10] sm:$0xff]  ;;  %s1794_s7 = smov 32   ;;  %s1795_s28 = smov 16  }
  0x1c   : > { %797 = vmatpush.bf16.msra.mxu0 %v1621_v3  ;;  %v1933_v10 = vrot.slane %v389_v7, 7  ;;  %v1956_v17 = vld [vmem:[%s385_s23] sm:$0xff]  ;;  %v1958_v20 = vld [vmem:[%s385_s23 + $0x8] sm:$0xff]  ;;  %v1962_v22 = vld [vmem:[%s385_s23 + $0x18] sm:$0xff]  ;;  %s2231_s23 = scalar_lea.vmem [#allocation3], %s1505_s22  ;;  %s1389_s22 = scalar_lea.hbm %s2312_s8, %s1639_s13 }
  0x1d   : > { %886 = vmatpush.bf16.msra.mxu1 %v1629_v4  ;;  %v1616_v27 = vld [vmem:[%s2306_s2 + $0x8] sm:$0xff]  ;;  %v1615_v33 = vld [vmem:[%s2306_s2] sm:$0xff]  ;;  %s1375_s10 = scalar_lea.sflag [#allocation4], %s362_s21 }
  0x1e   : > { %v403_v14 = vsel %vm402_vm0, %v1936_v11, %v1933_v10  ;;  %v1624_v28 = vld [vmem:[%s2306_s2 + $0x48] sm:$0xff]  ;;  %v1623_v34 = vld [vmem:[%s2306_s2 + $0x40] sm:$0xff]  ;;  %v405_v35 = vsel %vm404_vm1, %v1936_v11, %v1933_v10  ;;  %v408_v49 = vsel %vm407_vm2, %v1936_v11, %v1933_v10  ;;  %v411_v63 = vsel %vm410_vm3, %v1936_v11, %v1933_v10 }
  0x1f   : > { %v440_v18 = vperm.slane %v403_v14, 0  ;;  %v441_v19 = vperm.slane %v403_v14, 1  ;;  %v406_v38 = vrot.slane %v405_v35, 1  ;;  %v409_v52 = vrot.slane %v408_v49, 2 }
  0x20   : > { %798 = vmatpush.bf16.msra.mxu0 %v1620_v5  ;;  %v412_v2 = vrot.slane %v411_v63, 3 }
  0x21   : > { %887 = vmatpush.bf16.msra.mxu1 %v1628_v6  ;;  %v504_v23 = vadd.f32 %v440_v18, %v1956_v17  ;;  %v506_v24 = vadd.f32 %v440_v18, %v1960_v21  ;;  %v505_v25 = vadd.f32 %v441_v19, %v1958_v20  ;;  %v507_v26 = vadd.f32 %v441_v19, %v1962_v22 }
  0x22   : > { %v442_v39 = vperm.slane %v406_v38, 0  ;;  %v443_v40 = vperm.slane %v406_v38, 1  ;;  %v444_v53 = vperm.slane %v409_v52, 0  ;;  %v445_v54 = vperm.slane %v409_v52, 1 }
  0x23   : > { %v568_v29 = vmax.f32 %v504_v23, 0.0  ;;  %v570_v30 = vmax.f32 %v506_v24, 0.0  ;;  %v569_v31 = vmax.f32 %v505_v25, 0.0  ;;  %v571_v32 = vmax.f32 %v507_v26, 0.0 }
  0x24   : > { %799 = vmatpush.bf16.msra.mxu0 %v1619_v8  ;;  %v508_v41 = vadd.f32 %v442_v39, %v1956_v17  ;;  %v510_v42 = vadd.f32 %v442_v39, %v1960_v21  ;;  %v509_v43 = vadd.f32 %v443_v40, %v1958_v20  ;;  %v511_v44 = vadd.f32 %v443_v40, %v1962_v22  ;;  %v1638_v39 = vld [vmem:[%s2308_s4 + $0x38] sm:$0xff] }
  0x25   : > { %888 = vmatpush.bf16.msra.mxu1 %v1627_v9  ;;  %v632_v36 = vpack.c.bf16 %v570_v30, %v568_v29  ;;  %v633_v37 = vpack.c.bf16 %v571_v32, %v569_v31  ;;  %v512_v55 = vadd.f32 %v444_v53, %v1956_v17  ;;  %v514_v56 = vadd.f32 %v444_v53, %v1960_v21 }
  0x26   : > { %v572_v45 = vmax.f32 %v508_v41, 0.0  ;;  %v574_v46 = vmax.f32 %v510_v42, 0.0  ;;  %v573_v47 = vmax.f32 %v509_v43, 0.0  ;;  %v575_v48 = vmax.f32 %v511_v44, 0.0  ;;  %1090 = vmatpush.bf16.msra.mxu2 %v1638_v39 }
  0x27   : > { %v513_v57 = vadd.f32 %v445_v54, %v1958_v20  ;;  %v515_v58 = vadd.f32 %v445_v54, %v1962_v22  ;;  %v576_v59 = vmax.f32 %v512_v55, 0.0  ;;  %v578_v60 = vmax.f32 %v514_v56, 0.0  ;;  %v1637_v54 = vld [vmem:[%s2308_s4 + $0x30] sm:$0xff]  ;;  %v1636_v55 = vld [vmem:[%s2308_s4 + $0x28] sm:$0xff] }
  0x28   : > { %800 = vmatpush.bf16.msra.mxu0 %v1618_v12  ;;  %v634_v50 = vpack.c.bf16 %v574_v46, %v572_v45  ;;  %v635_v51 = vpack.c.bf16 %v575_v48, %v573_v47  ;;  %v446_v3 = vperm.slane %v412_v2, 0  ;;  %v447_v4 = vperm.slane %v412_v2, 1 }
  0x29   : > { %889 = vmatpush.bf16.msra.mxu1 %v1626_v13  ;;  %v577_v61 = vmax.f32 %v513_v57, 0.0  ;;  %v579_v62 = vmax.f32 %v515_v58, 0.0  ;;  %v636_v0 = vpack.c.bf16 %v578_v60, %v576_v59  ;;  %v420_v48 = vsel %vm419_vm6, %v1936_v11, %v1933_v10  ;;  %v1635_v60 = vld [vmem:[%s2308_s4 + $0x20] sm:$0xff] }
  0x2a   : > { %v516_v5 = vadd.f32 %v446_v3, %v1956_v17  ;;  %v518_v6 = vadd.f32 %v446_v3, %v1960_v21  ;;  %v517_v7 = vadd.f32 %v447_v4, %v1958_v20  ;;  %v519_v8 = vadd.f32 %v447_v4, %v1962_v22  ;;  %1091 = vmatpush.bf16.msra.mxu2 %v1637_v54 }
  0x2b   : > { %v637_v1 = vpack.c.bf16 %v579_v62, %v577_v61 }
  0x2c   : > { %801 = vmatpush.bf16.msra.mxu0 %v1617_v15  ;;  %v580_v9 = vmax.f32 %v516_v5, 0.0  ;;  %v582_v12 = vmax.f32 %v518_v6, 0.0  ;;  %v581_v13 = vmax.f32 %v517_v7, 0.0  ;;  %v583_v14 = vmax.f32 %v519_v8, 0.0  ;;  %v1634_v5 = vld [vmem:[%s2308_s4 + $0x18] sm:$0xff]  ;;  %v1633_v8 = vld [vmem:[%s2308_s4 + $0x10] sm:$0xff] }
  0x2d   : > { %890 = vmatpush.bf16.msra.mxu1 %v1625_v16  ;;  %v414_v15 = vsel %vm413_vm4, %v1936_v11, %v1933_v10 }
  0x2e   : > { %v638_v16 = vpack.c.bf16 %v582_v12, %v580_v9  ;;  %v639_v18 = vpack.c.bf16 %v583_v14, %v581_v13  ;;  %v415_v19 = vrot.slane %v414_v15, 4  ;;  %1092 = vmatpush.bf16.msra.mxu2 %v1636_v55  ;;  %v1632_v14 = vld [vmem:[%s2308_s4 + $0x8] sm:$0xff] }
  0x30   : > { %802 = vmatpush.bf16.msra.mxu0 %v1616_v27  ;;  %v448_v23 = vperm.slane %v415_v19, 0  ;;  %v449_v24 = vperm.slane %v415_v19, 1 }
  0x31   : > { %891 = vmatpush.bf16.msra.mxu1 %v1624_v28 }
  0x32   : > { %v520_v25 = vadd.f32 %v448_v23, %v1956_v17  ;;  %v522_v26 = vadd.f32 %v448_v23, %v1960_v21  ;;  %v521_v27 = vadd.f32 %v449_v24, %v1958_v20  ;;  %v523_v28 = vadd.f32 %v449_v24, %v1962_v22  ;;  %1093 = vmatpush.bf16.msra.mxu2 %v1635_v60  ;;  %v2054_v24 = vld [vmem:[%s1918_s17 + $0x10] sm:$0xff] }
  0x34   : > { %803 = vmatpush.bf16.msra.mxu0 %v1615_v33  ;;  %v584_v29 = vmax.f32 %v520_v25, 0.0  ;;  %v586_v30 = vmax.f32 %v522_v26, 0.0  ;;  %v585_v31 = vmax.f32 %v521_v27, 0.0  ;;  %v587_v32 = vmax.f32 %v523_v28, 0.0  ;;  %v1631_v25 = vld [vmem:[%s2308_s4] sm:$0xff] }
  0x35   : > { %892 = vmatpush.bf16.msra.mxu1 %v1623_v34  ;;  %v417_v33 = vsel %vm416_vm5, %v1936_v11, %v1933_v10 }
  0x36   : > { %v640_v34 = vpack.c.bf16 %v586_v30, %v584_v29  ;;  %v641_v35 = vpack.c.bf16 %v587_v32, %v585_v31  ;;  %1094 = vmatpush.bf16.msra.mxu2 %v1634_v5 }
  0x37   : > { %804 = vmatmul.bf16.vlgmr.msra.gmra.mxu0 %v632_v36  ;;  %v418_v36 = vrot.slane %v417_v33, 5 }
  0x38   : > { %893 = vmatmul.bf16.vlgmr.msra.gmra.mxu1 %v633_v37 }
  0x39   : > { %v450_v37 = vperm.slane %v418_v36, 0  ;;  %v451_v38 = vperm.slane %v418_v36, 1 }
  0x3a   : > { %1095 = vmatpush.bf16.msra.mxu2 %v1633_v8 }
  0x3b   : > { %v524_v40 = vadd.f32 %v450_v37, %v1956_v17  ;;  %v526_v41 = vadd.f32 %v450_v37, %v1960_v21  ;;  %v525_v42 = vadd.f32 %v451_v38, %v1958_v20  ;;  %v527_v43 = vadd.f32 %v451_v38, %v1962_v22 }
  0x3d   : > { %v588_v44 = vmax.f32 %v524_v40, 0.0  ;;  %v590_v45 = vmax.f32 %v526_v41, 0.0  ;;  %v589_v46 = vmax.f32 %v525_v42, 0.0  ;;  %v591_v47 = vmax.f32 %v527_v43, 0.0 }
  0x3e   : > { %1096 = vmatpush.bf16.msra.mxu2 %v1632_v14 }
  0x3f   : > { %v642_v49 = vpack.c.bf16 %v590_v45, %v588_v44  ;;  %v2072_v45 = vld [vmem:[%s2307_s3] ss:$0 sm:$0xff] }
  0x42   : > { %1097 = vmatpush.bf16.msra.mxu2 %v1631_v25 }
  0x47   : > { %809 = vmatmul.bf16.gmra.mxu0 %v634_v50  ;;  %v643_v50 = vpack.c.bf16 %v591_v47, %v589_v46 }
  0x48   : > { %898 = vmatmul.bf16.gmra.mxu1 %v635_v51  ;;  %v421_v51 = vrot.slane %v420_v48, 6 }
  0x4a   : > { %v452_v52 = vperm.slane %v421_v51, 0  ;;  %v453_v53 = vperm.slane %v421_v51, 1 }
  0x4c   : > { %v528_v56 = vadd.f32 %v452_v52, %v1956_v17  ;;  %v530_v57 = vadd.f32 %v452_v52, %v1960_v21  ;;  %v529_v58 = vadd.f32 %v453_v53, %v1958_v20  ;;  %v531_v59 = vadd.f32 %v453_v53, %v1962_v22 }
  0x4e   : > { %v592_v61 = vmax.f32 %v528_v56, 0.0  ;;  %v594_v62 = vmax.f32 %v530_v57, 0.0  ;;  %v593_v63 = vmax.f32 %v529_v58, 0.0 }
  0x50   : > { %v644_v2 = vpack.c.bf16 %v594_v62, %v592_v61 }
  0x57   : > { %814 = vmatmul.bf16.gmra.mxu0 %v636_v0  ;;  %v595_v0 = vmax.f32 %v531_v59, 0.0 }
  0x58   : > { %903 = vmatmul.bf16.gmra.mxu1 %v637_v1  ;;  %v423_v1 = vsel %vm422_vm7, %v1933_v10, %v1936_v11  ;;  %v391_v10 = vld [vmem:[%s1918_s17 + $0x18] sm:$0xff]  ;;  %s1793_s17 = smov 48  }
  0x59   : > { %v645_v3 = vpack.c.bf16 %v595_v0, %v593_v63  ;;  %v424_v4 = vrot.slane %v423_v1, 7  ;;  %v2051_v15 = vrot.slane %v391_v10, 7 }
  0x5b   : > { %v454_v6 = vperm.slane %v424_v4, 0  ;;  %v455_v7 = vperm.slane %v424_v4, 1  ;;  %v425_v28 = vsel %vm402_vm0, %v2054_v24, %v2051_v15  ;;  %v426_v39 = vsel %vm404_vm1, %v2054_v24, %v2051_v15 }
  0x5c   : > { %v456_v29 = vperm.slane %v425_v28, 0  ;;  %v457_v30 = vperm.slane %v425_v28, 1  ;;  %v427_v40 = vrot.slane %v426_v39, 1  ;;  %v428_v62 = vsel %vm407_vm2, %v2054_v24, %v2051_v15 }
  0x5d   : > { %v532_v11 = vadd.f32 %v454_v6, %v1956_v17  ;;  %v534_v9 = vadd.f32 %v454_v6, %v1960_v21  ;;  %v533_v12 = vadd.f32 %v455_v7, %v1958_v20  ;;  %v535_v13 = vadd.f32 %v455_v7, %v1962_v22 }
  0x5e   : > { %v536_v31 = vadd.f32 %v456_v29, %v1956_v17  ;;  %v538_v32 = vadd.f32 %v456_v29, %v1960_v21  ;;  %v537_v33 = vadd.f32 %v457_v30, %v1958_v20  ;;  %v458_v46 = vperm.slane %v427_v40, 0 }
  0x5f   : > { %v597_v19 = vmax.f32 %v533_v12, 0.0  ;;  %v599_v23 = vmax.f32 %v535_v13, 0.0  ;;  %v459_v47 = vperm.slane %v427_v40, 1  ;;  %v429_v1 = vrot.slane %v428_v62, 2 }
  0x60   : > { %v602_v36 = vmax.f32 %v538_v32, 0.0  ;;  %v601_v37 = vmax.f32 %v537_v33, 0.0  ;;  %v430_v29 = vsel %vm410_vm3, %v2054_v24, %v2051_v15 }
  0x61   : > { %v647_v27 = vpack.c.bf16 %v599_v23, %v597_v19  ;;  %v541_v51 = vadd.f32 %v459_v47, %v1958_v20  ;;  %v543_v52 = vadd.f32 %v459_v47, %v1962_v22  ;;  %v460_v7 = vperm.slane %v429_v1, 0 }
  0x62   : > { %v461_v8 = vperm.slane %v429_v1, 1  ;;  %v431_v32 = vrot.slane %v430_v29, 3 }
  0x63   : > { %v605_v60 = vmax.f32 %v541_v51, 0.0  ;;  %v607_v61 = vmax.f32 %v543_v52, 0.0 }
  0x64   : > { %v545_v12 = vadd.f32 %v461_v8, %v1958_v20  ;;  %v547_v13 = vadd.f32 %v461_v8, %v1962_v22  ;;  %v463_v39 = vperm.slane %v431_v32, 1 }
  0x65   : > { %v651_v4 = vpack.c.bf16 %v607_v61, %v605_v60 }
  0x66   : > { %v611_v28 = vmax.f32 %v547_v13, 0.0 }
  0x67   : > { %819 = vmatmul.bf16.gmra.mxu0 %v638_v16  ;;  %v596_v16 = vmax.f32 %v532_v11, 0.0  ;;  %v544_v11 = vadd.f32 %v460_v7, %v1956_v17 }
  0x68   : > { %908 = vmatmul.bf16.gmra.mxu1 %v639_v18  ;;  %v598_v18 = vmax.f32 %v534_v9, 0.0  ;;  %v546_v9 = vadd.f32 %v460_v7, %v1960_v21 }
  0x69   : > { %v608_v23 = vmax.f32 %v544_v11, 0.0 }
  0x6a   : > { %v646_v26 = vpack.c.bf16 %v598_v18, %v596_v16  ;;  %v610_v25 = vmax.f32 %v546_v9, 0.0 }
  0x77   : > { %824 = vmatmul.bf16.gmra.mxu0 %v640_v34  ;;  %v539_v34 = vadd.f32 %v457_v30, %v1962_v22 }
  0x78   : > { %913 = vmatmul.bf16.gmra.mxu1 %v641_v35  ;;  %v600_v35 = vmax.f32 %v536_v31, 0.0 }
  0x79   : > { %v603_v38 = vmax.f32 %v539_v34, 0.0  ;;  %v652_v34 = vpack.c.bf16 %v610_v25, %v608_v23 }
  0x7a   : > { %v648_v41 = vpack.c.bf16 %v602_v36, %v600_v35 }
  0x7b   : > { %v649_v42 = vpack.c.bf16 %v603_v38, %v601_v37  ;;  %v462_v38 = vperm.slane %v431_v32, 0 }
  0x87   : > { %829 = vmatmul.bf16.gmra.mxu0 %v642_v49  ;;  %v540_v49 = vadd.f32 %v458_v46, %v1956_v17 }
  0x88   : > { %918 = vmatmul.bf16.gmra.mxu1 %v643_v50  ;;  %v542_v50 = vadd.f32 %v458_v46, %v1960_v21 }
  0x89   : > { %v604_v57 = vmax.f32 %v540_v49, 0.0 }
  0x8a   : > { %v606_v58 = vmax.f32 %v542_v50, 0.0 }
  0x97   : > { %834 = vmatmul.bf16.gmra.mxu0 %v644_v2 }
  0x98   : > { %923 = vmatmul.bf16.gmra.mxu1 %v645_v3  ;;  %v650_v3 = vpack.c.bf16 %v606_v58, %v604_v57 }
  0xa7   : > { %839 = vmatmul.bf16.gmra.mxu0 %v646_v26 }
  0xa8   : > { %928 = vmatmul.bf16.gmra.mxu1 %v647_v27  ;;  %v609_v27 = vmax.f32 %v545_v12, 0.0 }
  0xaa   : > { %v653_v35 = vpack.c.bf16 %v611_v28, %v609_v27 }
  0xb4   : > { %v805_v43 = vpop.f32.mrf.mxu0 }
  0xb5   : > { %v894_v44 = vpop.f32.mrf.mxu1  ;;  %v806_v48 = vadd.f32 %v2072_v45, %v805_v43  ;;  %v549_v43 = vadd.f32 %v463_v39, %v1958_v20 }
  0xb7   : > { %844 = vmatmul.bf16.gmra.mxu0 %v648_v41  ;;  %v895_v55 = vadd.f32 %v894_v44, %v806_v48  ;;  %v548_v41 = vadd.f32 %v462_v38, %v1956_v17  ;;  %v551_v44 = vadd.f32 %v463_v39, %v1962_v22 }
  0xb8   : > { %933 = vmatmul.bf16.gmra.mxu1 %v649_v42  ;;  %v550_v42 = vadd.f32 %v462_v38, %v1960_v21 }
  0xb9   : > { %v974_v63 = vmax.f32 %v895_v55, 0.0  ;;  %v612_v50 = vmax.f32 %v548_v41, 0.0  ;;  %v432_v55 = vsel %vm413_vm4, %v2054_v24, %v2051_v15 }
  0xba   : > { %v614_v51 = vmax.f32 %v550_v42, 0.0  ;;  %v433_v58 = vrot.slane %v432_v55, 4 }
  0xbc   : > { %v807_v53 = vpop.f32.mrf.mxu0  ;;  %v654_v60 = vpack.c.bf16 %v614_v51, %v612_v50  ;;  %v465_v1 = vperm.slane %v433_v58, 1 }
  0xbd   : > { %v896_v54 = vpop.f32.mrf.mxu1  ;;  %v808_v56 = vadd.f32 %v2072_v45, %v807_v53  ;;  %v613_v53 = vmax.f32 %v549_v43, 0.0 }
  0xbf   : > { %v897_v59 = vadd.f32 %v896_v54, %v808_v56  ;;  %v615_v54 = vmax.f32 %v551_v44, 0.0 }
  0xc1   : > { %v975_v0 = vmax.f32 %v897_v59, 0.0  ;;  %v655_v61 = vpack.c.bf16 %v615_v54, %v613_v53 }
  0xc3   : > { %v1006_v2 = vpack.c.bf16 %v975_v0, %v974_v63  ;;  %v464_v0 = vperm.slane %v433_v58, 0 }
  0xc4   : > { %v810_v5 = vpop.f32.mrf.mxu0 }
  0xc5   : > { %v899_v6 = vpop.f32.mrf.mxu1  ;;  %1098 = vmatmul.bf16.vlgmr.msra.gmra.mxu2 %v1006_v2  ;;  %v811_v10 = vadd.f32 %v2072_v45, %v810_v5  ;;  %v553_v5 = vadd.f32 %v465_v1, %v1958_v20 }
  0xc7   : > { %849 = vmatmul.bf16.gmra.mxu0 %v650_v3  ;;  %v900_v18 = vadd.f32 %v899_v6, %v811_v10  ;;  %v552_v3 = vadd.f32 %v464_v0, %v1956_v17  ;;  %v555_v6 = vadd.f32 %v465_v1, %v1962_v22 }
  0xc8   : > { %938 = vmatmul.bf16.gmra.mxu1 %v651_v4  ;;  %v554_v4 = vadd.f32 %v464_v0, %v1960_v21 }
  0xc9   : > { %v976_v30 = vmax.f32 %v900_v18, 0.0  ;;  %v616_v9 = vmax.f32 %v552_v3, 0.0  ;;  %v434_v18 = vsel %vm416_vm5, %v2054_v24, %v2051_v15 }
  0xca   : > { %v618_v12 = vmax.f32 %v554_v4, 0.0  ;;  %v435_v25 = vrot.slane %v434_v18, 5 }
  0xcc   : > { %v812_v14 = vpop.f32.mrf.mxu0  ;;  %v656_v27 = vpack.c.bf16 %v618_v12, %v616_v9  ;;  %v467_v32 = vperm.slane %v435_v25, 1 }
  0xcd   : > { %v901_v16 = vpop.f32.mrf.mxu1  ;;  %v813_v19 = vadd.f32 %v2072_v45, %v812_v14  ;;  %v617_v14 = vmax.f32 %v553_v5, 0.0 }
  0xcf   : > { %v902_v26 = vadd.f32 %v901_v16, %v813_v19  ;;  %v619_v16 = vmax.f32 %v555_v6, 0.0 }
  0xd1   : > { %v977_v31 = vmax.f32 %v902_v26, 0.0  ;;  %v657_v28 = vpack.c.bf16 %v619_v16, %v617_v14 }
  0xd3   : > { %v1007_v33 = vpack.c.bf16 %v977_v31, %v976_v30  ;;  %v466_v31 = vperm.slane %v435_v25, 0 }
  0xd4   : > { %v815_v36 = vpop.f32.mrf.mxu0 }
  0xd5   : > { %v904_v37 = vpop.f32.mrf.mxu1  ;;  %1103 = vmatmul.bf16.gmra.mxu2 %v1007_v33  ;;  %v816_v40 = vadd.f32 %v2072_v45, %v815_v36  ;;  %v557_v36 = vadd.f32 %v467_v32, %v1958_v20 }
  0xd7   : > { %854 = vmatmul.bf16.gmra.mxu0 %v652_v34  ;;  %v905_v48 = vadd.f32 %v904_v37, %v816_v40  ;;  %v556_v34 = vadd.f32 %v466_v31, %v1956_v17  ;;  %v559_v37 = vadd.f32 %v467_v32, %v1962_v22 }
  0xd8   : > { %943 = vmatmul.bf16.gmra.mxu1 %v653_v35  ;;  %v558_v35 = vadd.f32 %v466_v31, %v1960_v21 }
  0xd9   : > { %v978_v56 = vmax.f32 %v905_v48, 0.0  ;;  %v620_v42 = vmax.f32 %v556_v34, 0.0  ;;  %v436_v48 = vsel %vm419_vm6, %v2054_v24, %v2051_v15 }
  0xda   : > { %v622_v43 = vmax.f32 %v558_v35, 0.0  ;;  %v437_v51 = vrot.slane %v436_v48, 6 }
  0xdc   : > { %v817_v46 = vpop.f32.mrf.mxu0  ;;  %v658_v53 = vpack.c.bf16 %v622_v43, %v620_v42  ;;  %v469_v58 = vperm.slane %v437_v51, 1 }
  0xdd   : > { %v906_v47 = vpop.f32.mrf.mxu1  ;;  %v818_v49 = vadd.f32 %v2072_v45, %v817_v46  ;;  %v621_v46 = vmax.f32 %v557_v36, 0.0 }
  0xdf   : > { %v907_v52 = vadd.f32 %v906_v47, %v818_v49  ;;  %v623_v47 = vmax.f32 %v559_v37, 0.0 }
  0xe1   : > { %v979_v57 = vmax.f32 %v907_v52, 0.0  ;;  %v659_v54 = vpack.c.bf16 %v623_v47, %v621_v46 }
  0xe3   : > { %v1008_v59 = vpack.c.bf16 %v979_v57, %v978_v56  ;;  %v468_v57 = vperm.slane %v437_v51, 0 }
  0xe4   : > { %v820_v62 = vpop.f32.mrf.mxu0 }
  0xe5   : > { %v909_v63 = vpop.f32.mrf.mxu1  ;;  %1108 = vmatmul.bf16.gmra.mxu2 %v1008_v59  ;;  %v821_v2 = vadd.f32 %v2072_v45, %v820_v62  ;;  %v561_v62 = vadd.f32 %v469_v58, %v1958_v20 }
  0xe7   : > { %859 = vmatmul.bf16.gmra.mxu0 %v654_v60  ;;  %v910_v10 = vadd.f32 %v909_v63, %v821_v2  ;;  %v560_v60 = vadd.f32 %v468_v57, %v1956_v17  ;;  %v563_v63 = vadd.f32 %v469_v58, %v1962_v22 }
  0xe8   : > { %948 = vmatmul.bf16.gmra.mxu1 %v655_v61  ;;  %v562_v61 = vadd.f32 %v468_v57, %v1960_v21 }
  0xe9   : > { %v980_v19 = vmax.f32 %v910_v10, 0.0  ;;  %v624_v4 = vmax.f32 %v560_v60, 0.0  ;;  %v438_v10 = vsel %vm422_vm7, %v2051_v15, %v2054_v24 }
  0xea   : > { %v626_v5 = vmax.f32 %v562_v61, 0.0  ;;  %v439_v12 = vrot.slane %v438_v10, 7 }
  0xec   : > { %v822_v7 = vpop.f32.mrf.mxu0  ;;  %v660_v14 = vpack.c.bf16 %v626_v5, %v624_v4  ;;  %v471_v25 = vperm.slane %v439_v12, 1 }
  0xed   : > { %v911_v8 = vpop.f32.mrf.mxu1  ;;  %v823_v11 = vadd.f32 %v2072_v45, %v822_v7  ;;  %v625_v7 = vmax.f32 %v561_v62, 0.0 }
  0xee   : > { %v565_v15 = vadd.f32 %v471_v25, %v1958_v20  ;;  %v567_v24 = vadd.f32 %v471_v25, %v1962_v22 }
  0xef   : > { %v912_v13 = vadd.f32 %v911_v8, %v823_v11  ;;  %v627_v8 = vmax.f32 %v563_v63, 0.0 }
  0xf0   : > { %v629_v36 = vmax.f32 %v565_v15, 0.0  ;;  %v631_v37 = vmax.f32 %v567_v24, 0.0 }
  0xf1   : > { %v981_v23 = vmax.f32 %v912_v13, 0.0  ;;  %v661_v16 = vpack.c.bf16 %v627_v8, %v625_v7 }
  0xf3   : > { %v1009_v26 = vpack.c.bf16 %v981_v23, %v980_v19  ;;  %v470_v23 = vperm.slane %v439_v12, 0 }
  0xf4   : > { %v825_v29 = vpop.f32.mrf.mxu0 }
  0xf5   : > { %v914_v30 = vpop.f32.mrf.mxu1  ;;  %1113 = vmatmul.bf16.gmra.mxu2 %v1009_v26  ;;  %v826_v33 = vadd.f32 %v2072_v45, %v825_v29 }
  0xf7   : > { %864 = vmatmul.bf16.gmra.mxu0 %v656_v27  ;;  %v915_v40 = vadd.f32 %v914_v30, %v826_v33  ;;  %v564_v27 = vadd.f32 %v470_v23, %v1956_v17 }
  0xf8   : > { %953 = vmatmul.bf16.gmra.mxu1 %v657_v28  ;;  %v566_v28 = vadd.f32 %v470_v23, %v1960_v21 }
  0xf9   : > { %v982_v49 = vmax.f32 %v915_v40, 0.0  ;;  %v628_v33 = vmax.f32 %v564_v27, 0.0 }
  0xfa   : > { %v630_v35 = vmax.f32 %v566_v28, 0.0 }
  0xfc   : > { %v827_v38 = vpop.f32.mrf.mxu0  ;;  %v662_v17 = vpack.c.bf16 %v630_v35, %v628_v33 }
  0xfd   : > { %v916_v39 = vpop.f32.mrf.mxu1  ;;  %v828_v41 = vadd.f32 %v2072_v45, %v827_v38 }
  0xff   : > { %v917_v44 = vadd.f32 %v916_v39, %v828_v41  ;;  %v663_v41 = vpack.c.bf16 %v631_v37, %v629_v36 }
 0x101   : > { %v983_v50 = vmax.f32 %v917_v44, 0.0 }
 0x103   : > { %v1010_v52 = vpack.c.bf16 %v983_v50, %v982_v49 }
 0x104   : > { %v830_v55 = vpop.f32.mrf.mxu0 }
 0x105   : > { %v919_v56 = vpop.f32.mrf.mxu1  ;;  %1118 = vmatmul.bf16.gmra.mxu2 %v1010_v52  ;;  %v831_v59 = vadd.f32 %v2072_v45, %v830_v55 }
 0x107   : > { %869 = vmatmul.bf16.gmra.mxu0 %v658_v53  ;;  %v920_v2 = vadd.f32 %v919_v56, %v831_v59 }
 0x108   : > { %958 = vmatmul.bf16.gmra.mxu1 %v659_v54 }
 0x109   : > { %v984_v11 = vmax.f32 %v920_v2, 0.0  ;;  %v2142_v2 = vld [vmem:[%s2309_s5] ss:$0 sm:$0xff] }
 0x10c   : > { %v832_v0 = vpop.f32.mrf.mxu0 }
 0x10d   : > { %v921_v1 = vpop.f32.mrf.mxu1  ;;  %v833_v3 = vadd.f32 %v2072_v45, %v832_v0 }
 0x10f   : > { %v922_v6 = vadd.f32 %v921_v1, %v833_v3 }
 0x111   : > { %v985_v9 = vmax.f32 %v922_v6, 0.0 }
 0x113   : > { %v1011_v13 = vpack.c.bf16 %v985_v9, %v984_v11 }
 0x114   : > { %v835_v18 = vpop.f32.mrf.mxu0 }
 0x115   : > { %v924_v19 = vpop.f32.mrf.mxu1  ;;  %1123 = vmatmul.bf16.gmra.mxu2 %v1011_v13  ;;  %v836_v26 = vadd.f32 %v2072_v45, %v835_v18 }
 0x117   : > { %874 = vmatmul.bf16.gmra.mxu0 %v660_v14  ;;  %v925_v31 = vadd.f32 %v924_v19, %v836_v26 }
 0x118   : > { %963 = vmatmul.bf16.gmra.mxu1 %v661_v16 }
 0x119   : > { %v986_v38 = vmax.f32 %v925_v31, 0.0 }
 0x11c   : > { %v837_v29 = vpop.f32.mrf.mxu0 }
 0x11d   : > { %v926_v30 = vpop.f32.mrf.mxu1  ;;  %v838_v32 = vadd.f32 %v2072_v45, %v837_v29 }
 0x11f   : > { %v927_v34 = vadd.f32 %v926_v30, %v838_v32 }
 0x121   : > { %v987_v39 = vmax.f32 %v927_v34, 0.0 }
 0x123   : > { %v1012_v40 = vpack.c.bf16 %v987_v39, %v986_v38 }
 0x124   : > { %v840_v21 = vpop.f32.mrf.mxu0 }
 0x125   : > { %v929_v42 = vpop.f32.mrf.mxu1  ;;  %1128 = vmatmul.bf16.gmra.mxu2 %v1012_v40  ;;  %v841_v20 = vadd.f32 %v2072_v45, %v840_v21 }
 0x127   : > { %879 = vmatmul.bf16.gmra.mxu0 %v662_v17  ;;  %v930_v44 = vadd.f32 %v929_v42, %v841_v20 }
 0x128   : > { %968 = vmatmul.bf16.gmra.mxu1 %v663_v41 }
 0x129   : > { %v988_v48 = vmax.f32 %v930_v44, 0.0 }
 0x12c   : > { %v842_v22 = vpop.f32.mrf.mxu0 }
 0x12d   : > { %v931_v43 = vpop.f32.mrf.mxu1  ;;  %v843_v46 = vadd.f32 %v2072_v45, %v842_v22 }
 0x12f   : > { %v932_v47 = vadd.f32 %v931_v43, %v843_v46 }
 0x131   : > { %v989_v49 = vmax.f32 %v932_v47, 0.0 }
 0x133   : > { %v1013_v50 = vpack.c.bf16 %v989_v49, %v988_v48 }
 0x134   : > { %v845_v51 = vpop.f32.mrf.mxu0 }
 0x135   : > { %v934_v52 = vpop.f32.mrf.mxu1  ;;  %1133 = vmatmul.bf16.gmra.mxu2 %v1013_v50  ;;  %v846_v53 = vadd.f32 %v2072_v45, %v845_v51 }
 0x137   : > { %v935_v56 = vadd.f32 %v934_v52, %v846_v53 }
 0x139   : > { %v990_v59 = vmax.f32 %v935_v56, 0.0 }
 0x13c   : > { %v847_v54 = vpop.f32.mrf.mxu0 }
 0x13d   : > { %v936_v55 = vpop.f32.mrf.mxu1  ;;  %v848_v57 = vadd.f32 %v2072_v45, %v847_v54 }
 0x13f   : > { %v937_v58 = vadd.f32 %v936_v55, %v848_v57 }
 0x141   : > { %v991_v60 = vmax.f32 %v937_v58, 0.0 }
 0x143   : > { %v1014_v61 = vpack.c.bf16 %v991_v60, %v990_v59 }
 0x144   : > { %v850_v62 = vpop.f32.mrf.mxu0 }
 0x145   : > { %v939_v63 = vpop.f32.mrf.mxu1  ;;  %1138 = vmatmul.bf16.gmra.mxu2 %v1014_v61  ;;  %v851_v1 = vadd.f32 %v2072_v45, %v850_v62 }
 0x147   : > { %v940_v5 = vadd.f32 %v939_v63, %v851_v1 }
 0x148   : > { %v1099_v0 = vpop.f32.mrf.mxu2 }
 0x149   : > { %v1100_v7 = vadd.f32 %v2142_v2, %v1099_v0  ;;  %v992_v11 = vmax.f32 %v940_v5, 0.0 }
 0x14b   : > { %v1179_v13 = vmax.f32 %v1100_v7, 0.0 }
 0x14c   : > { %v852_v3 = vpop.f32.mrf.mxu0 }
 0x14d   : > { %v941_v4 = vpop.f32.mrf.mxu1  ;;  %v853_v6 = vadd.f32 %v2072_v45, %v852_v3 }
 0x14f   : > { %v942_v8 = vadd.f32 %v941_v4, %v853_v6 }
 0x150   : > { %v1101_v10 = vpop.f32.mrf.mxu2 }
 0x151   : > { %v993_v9 = vmax.f32 %v942_v8, 0.0  ;;  %v1102_v12 = vadd.f32 %v2142_v2, %v1101_v10 }
 0x153   : > { %v1180_v14 = vmax.f32 %v1102_v12, 0.0  ;;  %v1015_v16 = vpack.c.bf16 %v993_v9, %v992_v11 }
 0x154   : > { %v855_v18 = vpop.f32.mrf.mxu0 }
 0x155   : > { %v944_v19 = vpop.f32.mrf.mxu1  ;;  %1143 = vmatmul.bf16.gmra.mxu2 %v1015_v16  ;;  %v2147_v23 = vpack.c.bf16 %v1180_v14, %v1179_v13  ;;  %v856_v26 = vadd.f32 %v2072_v45, %v855_v18 }
 0x157   : > { %v945_v15 = vadd.f32 %v944_v19, %v856_v26 }
 0x158   : > { %v1104_v25 = vpop.f32.mrf.mxu2 }
 0x159   : > { %v1105_v29 = vadd.f32 %v2142_v2, %v1104_v25  ;;  %v994_v32 = vmax.f32 %v945_v15, 0.0 }
 0x15b   : > { %v1181_v35 = vmax.f32 %v1105_v29, 0.0 }
 0x15c   : > { %v857_v27 = vpop.f32.mrf.mxu0 }
 0x15d   : > { %v946_v28 = vpop.f32.mrf.mxu1  ;;  %v858_v24 = vadd.f32 %v2072_v45, %v857_v27 }
 0x15f   : > { %v947_v30 = vadd.f32 %v946_v28, %v858_v24 }
 0x160   : > { %v1106_v31 = vpop.f32.mrf.mxu2 }
 0x161   : > { %v995_v33 = vmax.f32 %v947_v30, 0.0  ;;  %v1107_v34 = vadd.f32 %v2142_v2, %v1106_v31 }
 0x163   : > { %v1182_v36 = vmax.f32 %v1107_v34, 0.0  ;;  %v1016_v37 = vpack.c.bf16 %v995_v33, %v994_v32 }
 0x164   : > { %v860_v38 = vpop.f32.mrf.mxu0 }
 0x165   : > { %v949_v39 = vpop.f32.mrf.mxu1  ;;  %1148 = vmatmul.bf16.gmra.mxu2 %v1016_v37  ;;  %v2153_v40 = vpack.c.bf16 %v1182_v36, %v1181_v35  ;;  %v861_v41 = vadd.f32 %v2072_v45, %v860_v38 }
 0x167   : > { %v950_v20 = vadd.f32 %v949_v39, %v861_v41 }
 0x168   : > { %v1109_v17 = vpop.f32.mrf.mxu2 }
 0x169   : > { %v1110_v43 = vadd.f32 %v2142_v2, %v1109_v17  ;;  %v996_v47 = vmax.f32 %v950_v20, 0.0 }
 0x16b   : > { %v1183_v50 = vmax.f32 %v1110_v43, 0.0 }
 0x16c   : > { %v862_v21 = vpop.f32.mrf.mxu0 }
 0x16d   : > { %v951_v42 = vpop.f32.mrf.mxu1  ;;  %v863_v22 = vadd.f32 %v2072_v45, %v862_v21 }
 0x16f   : > { %v952_v44 = vadd.f32 %v951_v42, %v863_v22 }
 0x170   : > { %v1111_v46 = vpop.f32.mrf.mxu2 }
 0x171   : > { %v997_v48 = vmax.f32 %v952_v44, 0.0  ;;  %v1112_v49 = vadd.f32 %v2142_v2, %v1111_v46 }
 0x173   : > { %v1184_v51 = vmax.f32 %v1112_v49, 0.0  ;;  %v1017_v52 = vpack.c.bf16 %v997_v48, %v996_v47 }
 0x174   : > { %v865_v53 = vpop.f32.mrf.mxu0 }
 0x175   : > { %v954_v54 = vpop.f32.mrf.mxu1  ;;  %1153 = vmatmul.bf16.gmra.mxu2 %v1017_v52  ;;  %v2159_v55 = vpack.c.bf16 %v1184_v51, %v1183_v50  ;;  %v866_v57 = vadd.f32 %v2072_v45, %v865_v53 }
 0x177   : > { %v955_v60 = vadd.f32 %v954_v54, %v866_v57 }
 0x178   : > { %v1114_v56 = vpop.f32.mrf.mxu2 }
 0x179   : > { %v1115_v62 = vadd.f32 %v2142_v2, %v1114_v56  ;;  %v998_v1 = vmax.f32 %v955_v60, 0.0 }
 0x17b   : > { %v1185_v5 = vmax.f32 %v1115_v62, 0.0 }
 0x17c   : > { %v867_v58 = vpop.f32.mrf.mxu0 }
 0x17d   : > { %v956_v59 = vpop.f32.mrf.mxu1  ;;  %v868_v61 = vadd.f32 %v2072_v45, %v867_v58 }
 0x17f   : > { %v957_v63 = vadd.f32 %v956_v59, %v868_v61 }
 0x180   : > { %v1116_v0 = vpop.f32.mrf.mxu2 }
 0x181   : > { %v999_v3 = vmax.f32 %v957_v63, 0.0  ;;  %v1117_v4 = vadd.f32 %v2142_v2, %v1116_v0 }
 0x183   : > { %v1018_v6 = vpack.c.bf16 %v999_v3, %v998_v1  ;;  %v1186_v7 = vmax.f32 %v1117_v4, 0.0 }
 0x184   : > { %v870_v8 = vpop.f32.mrf.mxu0 }
 0x185   : > { %v959_v10 = vpop.f32.mrf.mxu1  ;;  %1158 = vmatmul.bf16.gmra.mxu2 %v1018_v6  ;;  %v2165_v11 = vpack.c.bf16 %v1186_v7, %v1185_v5  ;;  %v871_v12 = vadd.f32 %v2072_v45, %v870_v8 }
 0x187   : > { %v960_v16 = vadd.f32 %v959_v10, %v871_v12 }
 0x188   : > { %v1119_v9 = vpop.f32.mrf.mxu2 }
 0x189   : > { %v1120_v19 = vadd.f32 %v2142_v2, %v1119_v9  ;;  %v1000_v27 = vmax.f32 %v960_v16, 0.0 }
 0x18b   : > { %v1187_v24 = vmax.f32 %v1120_v19, 0.0 }
 0x18c   : > { %v872_v13 = vpop.f32.mrf.mxu0 }
 0x18d   : > { %v961_v14 = vpop.f32.mrf.mxu1  ;;  %v873_v18 = vadd.f32 %v2072_v45, %v872_v13 }
 0x18f   : > { %v962_v25 = vadd.f32 %v961_v14, %v873_v18 }
 0x190   : > { %v1121_v26 = vpop.f32.mrf.mxu2 }
 0x191   : > { %v1001_v28 = vmax.f32 %v962_v25, 0.0  ;;  %v1122_v15 = vadd.f32 %v2142_v2, %v1121_v26 }
 0x193   : > { %v1019_v29 = vpack.c.bf16 %v1001_v28, %v1000_v27  ;;  %v1188_v30 = vmax.f32 %v1122_v15, 0.0 }
 0x194   : > { %v875_v31 = vpop.f32.mrf.mxu0 }
 0x195   : > { %v964_v32 = vpop.f32.mrf.mxu1  ;;  %1163 = vmatmul.bf16.gmra.mxu2 %v1019_v29  ;;  %v1215_v33 = vpack.c.bf16 %v1188_v30, %v1187_v24  ;;  %v876_v35 = vadd.f32 %v2072_v45, %v875_v31 }
 0x197   : > { %v965_v38 = vadd.f32 %v964_v32, %v876_v35  ;;  %v1252_v24 = vsel %vm1235_vm8, %v1215_v33, 0  ;;  %v1249_v35 = vsel %vm1235_vm8, %v2165_v11, 0 }
 0x198   : > { %v1124_v34 = vpop.f32.mrf.mxu2 }
 0x199   : > { %v1002_v21 = vmax.f32 %v965_v38, 0.0  ;;  %v1125_v8 = vadd.f32 %v2142_v2, %v1124_v34  ;;  %v1246_v38 = vsel %vm1235_vm8, %v2159_v55, 0 }
 0x19b   : > { %v1189_v14 = vmax.f32 %v1125_v8, 0.0  ;;  %v1788_v8 = vmov 0  }
 0x19c   : > { %v877_v36 = vpop.f32.mrf.mxu0  ;;  %1705 = vset.pattern.permute.xlu0 %v1788_v8 }
 0x19d   : > { %v966_v37 = vpop.f32.mrf.mxu1  ;;  %v878_v39 = vadd.f32 %v2072_v45, %v877_v36 }
 0x19f   : > { %v967_v17 = vadd.f32 %v966_v37, %v878_v39 }
 0x1a0   : > { %v1126_v41 = vpop.f32.mrf.mxu2 }
 0x1a1   : > { %v1003_v42 = vmax.f32 %v967_v17, 0.0  ;;  %v1127_v6 = vadd.f32 %v2142_v2, %v1126_v41 }
 0x1a3   : > { %v1020_v20 = vpack.c.bf16 %v1003_v42, %v1002_v21  ;;  %v1190_v10 = vmax.f32 %v1127_v6, 0.0  ;;  %v1243_v42 = vsel %vm1235_vm8, %v2153_v40, 0  ;;  %v1228_v6 = vld [vmem:[#allocation2] sm:$0x1] }
 0x1a4   : > { %v880_v22 = vpop.f32.mrf.mxu0  ;;  %1231 = vperm.xlu0 %1705, %v1228_v6  }
 0x1a5   : > { %v969_v43 = vpop.f32.mrf.mxu1  ;;  %1168 = vmatmul.bf16.gmra.mxu2 %v1020_v20  ;;  %v881_v46 = vadd.f32 %v2072_v45, %v880_v22  ;;  %v1216_v25 = vpack.c.bf16 %v1190_v10, %v1189_v14  ;;  %v1240_v22 = vsel %vm1235_vm8, %v2147_v23, 0 }
 0x1a7   : > { %v970_v48 = vadd.f32 %v969_v43, %v881_v46  ;;  %v1255_v27 = vsel %vm1235_vm8, %v1216_v25, 0 }
 0x1a8   : > { %v1129_v44 = vpop.f32.mrf.mxu2 }
 0x1a9   : > { %v1004_v53 = vmax.f32 %v970_v48, 0.0  ;;  %v1130_v0 = vadd.f32 %v2142_v2, %v1129_v44 }
 0x1ab   : > { %v1191_v5 = vmax.f32 %v1130_v0, 0.0 }
 0x1ac   : > { %v882_v47 = vpop.f32.mrf.mxu0 }
 0x1ad   : > { %v883_v49 = vadd.f32 %v2072_v45, %v882_v47  ;;  %v971_v50 = vpop.f32.mrf.mxu1 }
 0x1af   : > { %v972_v51 = vadd.f32 %v971_v50, %v883_v49 }
 0x1b0   : > { %v1131_v52 = vpop.f32.mrf.mxu2 }
 0x1b1   : > { %v1005_v54 = vmax.f32 %v972_v51, 0.0  ;;  %v1132_v61 = vadd.f32 %v2142_v2, %v1131_v52 }
 0x1b3   : > { %v1021_v56 = vpack.c.bf16 %v1005_v54, %v1004_v53  ;;  %v1192_v1 = vmax.f32 %v1132_v61, 0.0 }
 0x1b5   : > { %1173 = vmatmul.bf16.gmra.mxu2 %v1021_v56  ;;  %v1217_v7 = vpack.c.bf16 %v1192_v1, %v1191_v5 }
 0x1b7   : > { %v1258_v12 = vsel %vm1235_vm8, %v1217_v7, 0 }
 0x1b8   : > { %v1134_v57 = vpop.f32.mrf.mxu2 }
 0x1b9   : > { %v1135_v58 = vadd.f32 %v2142_v2, %v1134_v57 }
 0x1bb   : > { %v1193_v62 = vmax.f32 %v1135_v58, 0.0 }
 0x1c0   : > { %v1136_v59 = vpop.f32.mrf.mxu2 }
 0x1c1   : > { %v1137_v60 = vadd.f32 %v2142_v2, %v1136_v59  ;;  %v1227_v59 = vld [vmem:[%s2310_s6] sm:$0x1] }
 0x1c3   : > { %v1194_v63 = vmax.f32 %v1137_v60, 0.0 }
 0x1c5   : > { %v1218_v45 = vpack.c.bf16 %v1194_v63, %v1193_v62 }
 0x1c7   : > { %v1261_v3 = vsel %vm1235_vm8, %v1218_v45, 0 }
 0x1c8   : > { %v1139_v4 = vpop.f32.mrf.mxu2  ;;  %1287 = vmatpush.bf16.xpose.msra.mxu3 %v1261_v3 }
 0x1c9   : > { %v1140_v9 = vadd.f32 %v2142_v2, %v1139_v4 }
 0x1cb   : > { %v1195_v18 = vmax.f32 %v1140_v9, 0.0 }
 0x1d0   : > { %v1141_v13 = vpop.f32.mrf.mxu2  ;;  %1288 = vmatpush.bf16.xpose.msra.mxu3 %v1258_v12 }
 0x1d1   : > { %v1142_v16 = vadd.f32 %v2142_v2, %v1141_v13 }
 0x1d3   : > { %v1196_v19 = vmax.f32 %v1142_v16, 0.0 }
 0x1d5   : > { %v2185_v26 = vpack.c.bf16 %v1196_v19, %v1195_v18 }
 0x1d8   : > { %v1144_v28 = vpop.f32.mrf.mxu2  ;;  %1289 = vmatpush.bf16.xpose.msra.mxu3 %v1255_v27 }
 0x1d9   : > { %v1145_v15 = vadd.f32 %v2142_v2, %v1144_v28 }
 0x1db   : > { %v1197_v31 = vmax.f32 %v1145_v15, 0.0  ;;  %v1264_v15 = vsel %vm1235_vm8, %v2185_v26, 0 }
 0x1e0   : > { %v1146_v29 = vpop.f32.mrf.mxu2  ;;  %1290 = vmatpush.bf16.xpose.msra.mxu3 %v1252_v24 }
 0x1e1   : > { %v1147_v30 = vadd.f32 %v2142_v2, %v1146_v29 }
 0x1e3   : > { %v1198_v32 = vmax.f32 %v1147_v30, 0.0 }
 0x1e5   : > { %v2191_v34 = vpack.c.bf16 %v1198_v32, %v1197_v31 }
 0x1e8   : > { %v1149_v36 = vpop.f32.mrf.mxu2  ;;  %1291 = vmatpush.bf16.xpose.msra.mxu3 %v1249_v35 }
 0x1e9   : > { %v1150_v37 = vadd.f32 %v2142_v2, %v1149_v36 }
 0x1eb   : > { %v1199_v17 = vmax.f32 %v1150_v37, 0.0 }
 0x1f0   : > { %v1151_v39 = vpop.f32.mrf.mxu2  ;;  %1292 = vmatpush.bf16.xpose.msra.mxu3 %v1246_v38 }
 0x1f1   : > { %v1152_v33 = vadd.f32 %v2142_v2, %v1151_v39 }
 0x1f3   : > { %v1200_v41 = vmax.f32 %v1152_v33, 0.0 }
 0x1f5   : > { %v1221_v21 = vpack.c.bf16 %v1200_v41, %v1199_v17 }
 0x1f7   : > { %v1270_v28 = vsel %vm1235_vm8, %v1221_v21, 0 }
 0x1f8   : > { %v1154_v20 = vpop.f32.mrf.mxu2  ;;  %1293 = vmatpush.bf16.xpose.msra.mxu3 %v1243_v42 }
 0x1f9   : > { %v1155_v11 = vadd.f32 %v2142_v2, %v1154_v20 }
 0x1fb   : > { %v1201_v44 = vmax.f32 %v1155_v11, 0.0 }
 0x200   : > { %v1156_v43 = vpop.f32.mrf.mxu2  ;;  %1294 = vmatpush.bf16.xpose.msra.mxu3 %v1240_v22 }
 0x201   : > { %v1157_v55 = vadd.f32 %v2142_v2, %v1156_v43 }
 0x203   : > { %v1202_v46 = vmax.f32 %v1157_v55, 0.0 }
 0x205   : > { %v1222_v47 = vpack.c.bf16 %v1202_v46, %v1201_v44 }
 0x207   : > { %1606 = vmatmul.msk.bf16.vlgmr.msra.gmra.mxu3 %vm1235_vm8, %v1227_v59  ;;  %v1273_v27 = vsel %vm1235_vm8, %v1222_v47, 0 }
 0x208   : > { %v1159_v48 = vpop.f32.mrf.mxu2 }
 0x209   : > { %v1160_v49 = vadd.f32 %v2142_v2, %v1159_v48 }
 0x20b   : > { %v1203_v51 = vmax.f32 %v1160_v49, 0.0 }
 0x210   : > { %v1161_v50 = vpop.f32.mrf.mxu2 }
 0x211   : > { %v1162_v40 = vadd.f32 %v2142_v2, %v1161_v50 }
 0x213   : > { %v1204_v52 = vmax.f32 %v1162_v40, 0.0 }
 0x215   : > { %v1223_v53 = vpack.c.bf16 %v1204_v52, %v1203_v51 }
 0x216   : > { %v1232_v24 = vpop.permute.xlu0 %1231 }
 0x217   : > { %v1276_v25 = vsel %vm1235_vm8, %v1223_v53, 0  ;;  %v1234_v30 = vperm.slane %v1232_v24, 0 }
 0x218   : > { %v1164_v54 = vpop.f32.mrf.mxu2 }
 0x219   : > { %v1165_v12 = vadd.f32 %v2142_v2, %v1164_v54 }
 0x21b   : > { %v1205_v16 = vmax.f32 %v1165_v12, 0.0 }
 0x220   : > { %v1166_v56 = vpop.f32.mrf.mxu2 }
 0x221   : > { %v1167_v10 = vadd.f32 %v2142_v2, %v1166_v56 }
 0x223   : > { %v1206_v13 = vmax.f32 %v1167_v10, 0.0 }
 0x225   : > { %v1224_v18 = vpack.c.bf16 %v1206_v13, %v1205_v16 }
 0x227   : > { %v1279_v19 = vsel %vm1235_vm8, %v1224_v18, 0 }
 0x228   : > { %v1169_v57 = vpop.f32.mrf.mxu2 }
 0x229   : > { %v1170_v1 = vadd.f32 %v2142_v2, %v1169_v57 }
 0x22b   : > { %v1207_v7 = vmax.f32 %v1170_v1, 0.0 }
 0x230   : > { %v1171_v23 = vpop.f32.mrf.mxu2 }
 0x231   : > { %v1172_v63 = vadd.f32 %v2142_v2, %v1171_v23 }
 0x233   : > { %v1208_v4 = vmax.f32 %v1172_v63, 0.0 }
 0x235   : > { %v1225_v9 = vpack.c.bf16 %v1208_v4, %v1207_v7 }
 0x237   : > { %v1282_v14 = vsel %vm1235_vm8, %v1225_v9, 0 }
 0x238   : > { %v1174_v58 = vpop.f32.mrf.mxu2 }
 0x239   : > { %v1175_v60 = vadd.f32 %v2142_v2, %v1174_v58 }
 0x23b   : > { %v1209_v0 = vmax.f32 %v1175_v60, 0.0 }
 0x240   : > { %v1176_v61 = vpop.f32.mrf.mxu2 }
 0x241   : > { %v1177_v62 = vadd.f32 %v2142_v2, %v1176_v61  ;;  %v1267_v2 = vsel %vm1235_vm8, %v2191_v34, 0 }
 0x243   : > { %v1210_v45 = vmax.f32 %v1177_v62, 0.0 }
 0x245   : > { %v1226_v3 = vpack.c.bf16 %v1210_v45, %v1209_v0 }
 0x247   : > { %v1285_v5 = vsel %vm1235_vm8, %v1226_v3, 0 }
 0x248   : > { %1300 = vmatpush.bf16.xpose.msrb.mxu3 %v1285_v5 }
 0x250   : > { %1301 = vmatpush.bf16.xpose.msrb.mxu3 %v1282_v14 }
 0x258   : > { %1302 = vmatpush.bf16.xpose.msrb.mxu3 %v1279_v19 }
 0x260   : > { %1303 = vmatpush.bf16.xpose.msrb.mxu3 %v1276_v25 }
 0x268   : > { %1304 = vmatpush.bf16.xpose.msrb.mxu3 %v1273_v27 }
 0x270   : > { %1305 = vmatpush.bf16.xpose.msrb.mxu3 %v1270_v28 }
 0x278   : > { %1306 = vmatpush.bf16.xpose.msrb.mxu3 %v1267_v2 }
 0x280   : > { %1307 = vmatpush.bf16.xpose.msrb.mxu3 %v1264_v15 }
 0x287   : > { %1607 = vmatmul.msk.bf16.vlgmr.msrb.gmra.mxu3 %vm1235_vm8, %v1227_v59 }
 0x28a   : > { %v1296_v29 = vpop.f32.mrf.mxu3 }
 0x28b   : > { %v1297_v31 = vadd.f32 %v1296_v29, %v1234_v30 }
 0x28d   : > { %1314 = vst.msk [vmem:[%s2231_s23] sm:$0x1] %vm1313_vm9, %v1297_v31  ;;  %1320 = vrot.lane.b32.xlu1 %v1297_v31, %s1789_s24  ;;  %1328 = vrot.lane.b32.xlu2 %v1297_v31, %s1790_s25 }
 0x28e   : > { %1316 = vrot.lane.b32.xlu0 %v1297_v31, %s1791_s26 }
 0x292   : > { %v1298_v26 = vpop.f32.mrf.mxu3 }
 0x295   : > { %1324 = vrot.lane.b32.xlu1 %v1297_v31, %s1792_s27  ;;  %1332 = vrot.lane.b32.xlu2 %v1297_v31, %s1793_s17 }
 0x296   : > { %1336 = vrot.lane.b32.xlu0 %v1297_v31, %s1794_s7 }
 0x29d   : > { %1340 = vrot.lane.b32.xlu1 %v1297_v31, %s1795_s28 }
 0x2e7   : > { %v1329_v36 = vpop.permute.xlu2 %1328 }
 0x2e8   : > { %1331 = vst.msk [vmem:[%s2231_s23 + $0x4] sm:$0x1] %vm1313_vm9, %v1329_v36 }
 0x2ef   : > { %v1333_v37 = vpop.permute.xlu2 %1332 }
 0x2f0   : > { %1335 = vst.msk [vmem:[%s2231_s23 + $0x5] sm:$0x1] %vm1313_vm9, %v1333_v37 }
 0x2ff   : > { %v1321_v38 = vpop.permute.xlu1 %1320 }
 0x300   : > { %1323 = vst.msk [vmem:[%s2231_s23 + $0x2] sm:$0x1] %vm1313_vm9, %v1321_v38  ;;  %v1317_v39 = vpop.permute.xlu0 %1316 }
 0x301   : > { %1319 = vst.msk [vmem:[%s2231_s23 + $0x1] sm:$0x1] %vm1313_vm9, %v1317_v39 }
 0x307   : > { %v1325_v33 = vpop.permute.xlu1 %1324 }
 0x308   : > { %1327 = vst.msk [vmem:[%s2231_s23 + $0x3] sm:$0x1] %vm1313_vm9, %v1325_v33  ;;  %v1337_v41 = vpop.permute.xlu0 %1336 }
 0x309   : > { %1339 = vst.msk [vmem:[%s2231_s23 + $0x6] sm:$0x1] %vm1313_vm9, %v1337_v41 }
 0x30a   : > { %v1309_v32 = vpop.f32.mrf.mxu3 }
 0x30b   : > { %v1310_v34 = vadd.f32 %v1309_v32, %v1234_v30 }
 0x30d   : > { %1344 = vst.msk [vmem:[%s2231_s23 + $0x8] sm:$0x1] %vm1313_vm9, %v1310_v34  ;;  %1346 = vrot.lane.b32.xlu2 %v1310_v34, %s1791_s26  ;;  %1354 = vrot.lane.b32.xlu1 %v1310_v34, %s1792_s27 }
 0x30e   : > { %1350 = vrot.lane.b32.xlu0 %v1310_v34, %s1789_s24  ;;  %s1390_s24 = sshll.u32 %s2231_s23, 4  ;;  %s1391_s24 = int_to_ptr.vmem [resolvable:$true] %s1390_s24 }
 0x30f   : > { %v1341_v17 = vpop.permute.xlu1 %1340 }
 0x310   : > { %1343 = vst.msk [vmem:[%s2231_s23 + $0x7] sm:$0x1] %vm1313_vm9, %v1341_v17 }
 0x312   : > { %v1311_v35 = vpop.f32.mrf.mxu3 }
 0x315   : > { %1358 = vrot.lane.b32.xlu2 %v1310_v34, %s1790_s25  ;;  %1366 = vrot.lane.b32.xlu1 %v1310_v34, %s1794_s7  ;;  %s1392_s25 = sshll.u32 %s1389_s22, 4  ;;  %s1393_s25 = int_to_ptr.hbm [resolvable:$true] %s1392_s25 }
 0x316   : > { %1362 = vrot.lane.b32.xlu0 %v1310_v34, %s1793_s17  ;;  %s1722_s26 = sshra.s32 %s1393_s25, 4  ;;  %s1723_s26 = int_to_ptr.hbm [resolvable:$true] %s1722_s26 }
 0x317   : > { %s1724_s27 = scalar_lea.hbm %s1723_s26, 16  ;;  %p1729_p1 = scmp.lt.s32.totalorder %s1723_s26, %s2312_s8 }
 0x318   : > { %p1725_p12 = scmp.ne.s32.totalorder %s1723_s26, %s1724_s27 }
 0x31a   : > { %p1726_p13 = pnand %p1725_p12, %p1886_p4 }
 0x31c   : > { %p1727_p0 = pneg %p1726_p13 }
 0x31d   : > { %1370 = vrot.lane.b32.xlu2 %v1310_v34, %s1795_s28  ;;  %s1728_s28 = scalar_lea.hbm %s2312_s8, 32 }
 0x31e   : > { %p1730_p2 = scmp.lt.s32.totalorder %s1728_s28, %s1724_s27 }
 0x320   : > { %p1731_p3 = por %p1730_p2, %p1729_p1 }
 0x322   : > { %p1732_p5 = pnand %p1731_p3, %p1727_p0 }
 0x367   : > { %v1347_v21 = vpop.permute.xlu2 %1346 }
 0x368   : > { %1349 = vst.msk [vmem:[%s2231_s23 + $0x9] sm:$0x1] %vm1313_vm9, %v1347_v21 }
 0x36f   : > { %v1359_v42 = vpop.permute.xlu2 %1358 }
 0x370   : > { %1361 = vst.msk [vmem:[%s2231_s23 + $0xc] sm:$0x1] %vm1313_vm9, %v1359_v42 }
 0x377   : > { %v1371_v20 = vpop.permute.xlu2 %1370 }
 0x378   : > { %1373 = vst.msk [vmem:[%s2231_s23 + $0xf] sm:$0x1] %vm1313_vm9, %v1371_v20 }
 0x37f   : > { %v1355_v11 = vpop.permute.xlu1 %1354 }
 0x380   : > { %1357 = vst.msk [vmem:[%s2231_s23 + $0xb] sm:$0x1] %vm1313_vm9, %v1355_v11  ;;  %v1351_v22 = vpop.permute.xlu0 %1350 }
 0x381   : > { %1353 = vst.msk [vmem:[%s2231_s23 + $0xa] sm:$0x1] %vm1313_vm9, %v1351_v22 }
 0x387   : > { %v1367_v43 = vpop.permute.xlu1 %1366 }
 0x388   : > { %1369 = vst.msk [vmem:[%s2231_s23 + $0xe] sm:$0x1] %vm1313_vm9, %v1367_v43  ;;  %v1363_v55 = vpop.permute.xlu0 %1362 }
 0x389   : > { %1365 = vst.msk [vmem:[%s2231_s23 + $0xd] sm:$0x1] %vm1313_vm9, %v1363_v55 }
 0x38a   : > { %1735 = shalt.err (!%p1732_p5)
}
 0x38b   : > { %s1796_s21 = smov 128   ;;  %s1797_s23 = smov 8  }
 0x38c   : > { %1640 = dma.vmem_to_hbm [thread:$0]  (%p1886_p4), %s1391_s24, 256, %s1393_s25, %s1375_s10, %s1796_s21, %s1796_s21, %s1797_s23  }
 0x38d PF: > { %p1646_p6 = scmp.ge.s32.totalorder %s1786_s12, 2  ;;  %s1407_s20 = sand.u32 1, %s1766_s29  }
 0x38e   : > { %s1408_s22 = scalar_lea.sflag [#allocation4], %s1407_s20 }
 0x38f   : > { %p1643_p7 = pnand %p1646_p6, %p1893_p8 }
 0x391   : > { %p1644_p9 = pneg %p1643_p7 }
 0x393   : > { %1761 = dma.done.wait (%p1644_p9), %s1408_s22, 256  }
 0x394   : > { %1763 = vsyncadd (%p1644_p9), %s1408_s22, 4294967040  ;;  %s23_s12 = sadd.s32 1, %s1786_s12   ;;  %s2315_s29 = smov %s1770_s30 }
 0x395   : > { %p20_p10 = scmp.ge.s32.totalorder %s23_s12, 4   ;;  %s2316_s30 = smov %s1774_s9 }
 0x396   : > { %s2317_s9 = smov %s1899_s19  ;;  %s2318_s10 = smov %s1782_s11 }
 0x397   : > { %s2319_s11 = smov %s2321_s14  ;;  %22 = sbr.rel (!%p20_p10) target bundleno = 7 (0x7), region = 90 }
 0x39c   :  { %1414 = vsyncpa [#allocation4], 1 }
 0x39d   :  { %1416 = vsyncpa [#allocation4 + $0x1], 1 }

</bundles_post_ra>
